<compile_context>
chip_gen: v5e
topology: v5e:2x2
jax: 0.10.0
libtpu: 0.0.40
codegen_flags: <defaults>
</compile_context>

<pallas_src>
import jax
import jax.numpy as jnp
from jax import lax
from jax.experimental import pallas as pl
from jax.experimental.pallas import tpu as pltpu

R = 4                  # inner rank, fixed by Aw shape (1, nb_l, 4)
NEG_SLOPE = -0.1       # nn.LeakyReLU(-0.1)
LANE = 128


def _leaky_relu(x, slope):
    # torch.nn.LeakyReLU: x if x >= 0 else slope * x
    return jnp.where(x >= 0, x, slope * x)


def _round_up(x, m):
    return ((x + m - 1) // m) * m


def _tpu_vmem_bytes():
    """Per-TensorCore VMEM capacity; conservative 64 MiB fallback (v7x)."""
    try:
        info = pltpu.get_tpu_info()
        v = int(getattr(info, "vmem_capacity_bytes", 0) or 0)
        if v > 0:
            return v
    except Exception:
        pass
    return 64 * 1024 * 1024


def _choose_batch_block(B, nb_l_p, nb_c_p, nb_layers, vmem_bytes, dual_tc):
    """Pick batch elements per grid step.

    Budget the double-buffered pipelined tiles against ~half of an explicit
    vmem_limit (itself ~3/4 of physical per-core VMEM). bb must divide B.
    Single-TC parts (v5e/v6e, 128 MiB): no grid-length constraint. Dual-TC
    parts (v7x-like, <=64 MiB): keep the grid >= 2 and prefer an even length
    so both TensorCores get work under dimension_semantics=("parallel",).
    """
    vmem_limit = max(32 << 20, int(vmem_bytes) * 3 // 4)
    budget = vmem_limit // 2
    # Double-buffered per-element tiles: V + (wt in/out) + (h in/out), f32.
    per_elem = 4 * (nb_l_p * nb_c_p + 2 * R * nb_l_p + 2 * R * nb_c_p)
    # Double-buffered grid-invariant gate block.
    fixed = 2 * 4 * nb_layers * R * nb_l_p
    vmem_bb = max(1, (budget - fixed) // (2 * per_elem))

    if dual_tc:
        cap = max(1, min(vmem_bb, B // 2 if B >= 2 else 1))
    else:
        cap = max(1, min(vmem_bb, B))
    cap = min(cap, B)

    divisors = [d for d in range(1, cap + 1) if B % d == 0]
    if dual_tc:
        even = [d for d in divisors if (B // d) % 2 == 0]
        if even:
            return even[-1], vmem_limit
    return divisors[-1], vmem_limit


def _make_lmu_kernel(nb_layers, batch_block, nb_l, nb_c, nb_l_p, nb_c_p):
    pad_c = nb_c_p != nb_c
    pad_l = nb_l_p != nb_l

    def lmu_kernel(gate_ref, v_ref, wt_ref, h_ref, h_out_ref, wt_out_ref):
        # Lane-validity masks for zero-padded columns (hoisted out of all loops).
        c_mask = (lax.broadcasted_iota(jnp.int32, (R, nb_c_p), 1) < nb_c) if pad_c else None
        l_mask = (lax.broadcasted_iota(jnp.int32, (R, nb_l_p), 1) < nb_l) if pad_l else None

        def batch_body(bi, carry):
            wt = wt_ref[bi]          # (R, nb_l_p)  == W^T, lane-dense
            h = h_ref[bi]            # (R, nb_c_p)

            for i in range(nb_layers):            # static unroll (small)
                g = gate_ref[i]                   # (R, nb_l_p) lazy per-layer load
                v = v_ref[bi]                     # (nb_l_p, nb_c_p) reload per layer
                                                  # (VMEM loads are cheap; bounds live range)

                # ---- H update: Gn = W^T V (MXU, contraction over nb_l);
                #      Gp = (W^T W) H, reassociated, rank-4 -> unrolled VPU FMAs.
                gn = jnp.dot(wt, v, preferred_element_type=jnp.float32)      # (R, nb_c_p)
                gp = None
                for s in range(R):
                    col = jnp.sum(wt * wt[s:s + 1, :], axis=1, keepdims=True)  # (R,1)
                    term = col * h[s:s + 1, :]                                 # (R, nb_c_p)
                    gp = term if gp is None else gp + term
                h = h * (gn / gp)
                if pad_c:
                    h = jnp.where(c_mask, h, 0.0)   # keep padded cols exactly 0 (no NaN)

                # ---- W update (transposed layout):
                #      Gn_w^T = H V^T via dot_general contracting last-last (no V^T stream);
                #      Gp_w^T = (H H^T) W^T, rank-4 -> unrolled VPU FMAs.
                gn_wt = lax.dot_general(
                    h, v, (((1,), (1,)), ((), ())),
                    preferred_element_type=jnp.float32)                      # (R, nb_l_p)
                gp_wt = None
                for s in range(R):
                    col = jnp.sum(h * h[s:s + 1, :], axis=1, keepdims=True)  # (R,1) = (H H^T)[:, s]
                    term = col * wt[s:s + 1, :]                              # (R, nb_l_p)
                    gp_wt = term if gp_wt is None else gp_wt + term
                wt = wt * (g * (gn_wt / gp_wt))
                if pad_l:
                    wt = jnp.where(l_mask, wt, 0.0)

            h_out_ref[bi] = h
            wt_out_ref[bi] = wt
            return carry

        # TODO(synk): optionally pack two batch elements into the 8 sublanes
        # (R=4 uses only half a vreg) to double VPU density of the rank-4 work.
        lax.fori_loop(0, batch_block, batch_body, 0)

    return lmu_kernel


def lmu_2nd_forward(V, W, H, Aw):
    """Runs nb_layers multiplicative NMF updates. Returns (H, W) in the
    original (B, R, nb_c) / (B, nb_l, R) layouts."""
    V = jnp.asarray(V, jnp.float32)
    W = jnp.asarray(W, jnp.float32)
    H = jnp.asarray(H, jnp.float32)
    Aw = jnp.asarray(Aw, jnp.float32)

    B, nb_l, nb_c = V.shape
    nb_layers = Aw.shape[0]
    assert W.shape == (B, nb_l, R)
    assert H.shape == (B, R, nb_c)
    assert Aw.shape == (nb_layers, nb_l, R)

    # Lane-dense padding targets (unmasked stores; aligned MXU tiles).
    nb_c_p = _round_up(nb_c, LANE)
    nb_l_p = _round_up(nb_l, LANE)

    vmem_bytes = _tpu_vmem_bytes()
    dual_tc = vmem_bytes <= (80 << 20)   # v7x-like: 64 MiB/TC, 2 TensorCores
    bb, vmem_limit = _choose_batch_block(B, nb_l_p, nb_c_p, nb_layers, vmem_bytes, dual_tc)
    grid = (B // bb,)

    # Batch/layer-invariant precompute, single XLA ops outside the kernel.
    gate = jnp.swapaxes(_leaky_relu(Aw, NEG_SLOPE), 1, 2)   # (nb_layers, R, nb_l)
    wt_in = jnp.swapaxes(W, 1, 2)                           # (B, R, nb_l) lane-dense W^T

    def pad_last(x, target):
        p = target - x.shape[-1]
        if p == 0:
            return x
        return jnp.pad(x, [(0, 0)] * (x.ndim - 1) + [(0, p)])

    gate = pad_last(gate, nb_l_p)                           # (nb_layers, R, nb_l_p)
    wt_in = pad_last(wt_in, nb_l_p)                         # (B, R, nb_l_p)
    h_in = pad_last(H, nb_c_p)                              # (B, R, nb_c_p)
    if nb_l_p != nb_l or nb_c_p != nb_c:
        v_in = jnp.pad(V, ((0, 0), (0, nb_l_p - nb_l), (0, nb_c_p - nb_c)))
    else:
        v_in = V

    kernel = _make_lmu_kernel(nb_layers, bb, nb_l, nb_c, nb_l_p, nb_c_p)

    h_out, wt_out = pl.pallas_call(
        kernel,
        out_shape=(
            jax.ShapeDtypeStruct((B, R, nb_c_p), jnp.float32),
            jax.ShapeDtypeStruct((B, R, nb_l_p), jnp.float32),
        ),
        grid_spec=pltpu.PrefetchScalarGridSpec(
            num_scalar_prefetch=0,
            grid=grid,
            in_specs=[
                # gate: same full parameter block every grid step.
                pl.BlockSpec((nb_layers, R, nb_l_p), lambda b: (0, 0, 0)),
                # V, W^T, H: one batch block per grid step (no V^T stream).
                pl.BlockSpec((bb, nb_l_p, nb_c_p), lambda b: (b, 0, 0)),
                pl.BlockSpec((bb, R, nb_l_p), lambda b: (b, 0, 0)),
                pl.BlockSpec((bb, R, nb_c_p), lambda b: (b, 0, 0)),
            ],
            out_specs=[
                pl.BlockSpec((bb, R, nb_c_p), lambda b: (b, 0, 0)),
                pl.BlockSpec((bb, R, nb_l_p), lambda b: (b, 0, 0)),
            ],
        ),
        compiler_params=pltpu.CompilerParams(
            dimension_semantics=("parallel",),
            vmem_limit_bytes=int(vmem_limit),
        ),
    )(gate, v_in, wt_in, h_in)

    # Strip padding and return the module's output layouts.
    h_out = h_out[:, :, :nb_c]
    w_out = jnp.swapaxes(wt_out[:, :, :nb_l], 1, 2)
    return h_out, w_out


def lmu_2nd_reference(V, W, H, Aw):
    """Pure-JAX reference mirroring the PyTorch forward (original associativity)."""
    hi = jax.lax.Precision.HIGHEST
    nb_layers = Aw.shape[0]
    for i in range(nb_layers):
        b = _leaky_relu(Aw[i][None], NEG_SLOPE)                       # (1, nb_l, R)
        wh = jnp.einsum('blr,brc->blc', W, H, precision=hi)
        gp = jnp.einsum('blr,blc->brc', W, wh, precision=hi)
        gn = jnp.einsum('blr,blc->brc', W, V, precision=hi)
        H = H * (gn / gp)
        hht = jnp.einsum('brc,bsc->brs', H, H, precision=hi)
        gp_w = jnp.einsum('blr,brs->bls', W, hht, precision=hi)
        gn_w = jnp.einsum('blc,brc->blr', V, H, precision=hi)
        W = W * (b * (gn_w / gp_w))
    return H, W


if __name__ == "__main__":
    B, nb_l, nb_c, nb_layers = 2, 16, 32, 3

    key = jax.random.PRNGKey(0)
    kv, kw, kh = jax.random.split(key, 3)
    # NMF-style nonnegative inputs (keeps denominators well away from zero).
    V = jax.random.uniform(kv, (B, nb_l, nb_c), jnp.float32, 0.1, 1.0)
    W = jax.random.uniform(kw, (B, nb_l, R), jnp.float32, 0.1, 1.0)
    H = jax.random.uniform(kh, (B, R, nb_c), jnp.float32, 0.1, 1.0)
    # Parameter init exactly as in __init__: Aw = ones((nb_l, 4)) per layer.
    Aw = jnp.ones((nb_layers, nb_l, R), jnp.float32)

    h_out, w_out = lmu_2nd_forward(V, W, H, Aw)
    jax.block_until_ready((h_out, w_out))

    h_ref, w_ref = lmu_2nd_reference(V, W, H, Aw)
    assert h_out.shape == h_ref.shape and w_out.shape == w_ref.shape
    assert jnp.allclose(h_out, h_ref, rtol=1e-4, atol=1e-4), "H mismatch"
    assert jnp.allclose(w_out, w_ref, rtol=1e-4, atol=1e-4), "W mismatch"
    assert not (jnp.any(jnp.isnan(h_out)) or jnp.any(jnp.isnan(w_out))), "NaN in outputs"

    print("KERNEL_OK")
</pallas_src>

<mosaic_0001>
module attributes {stable_mosaic.version = 11 : i64} {
  func.func @lmu_kernel(%arg0: i32, %arg1: memref<3x4x128xf32, #tpu.memory_space<vmem>>, %arg2: memref<1x128x128xf32, #tpu.memory_space<vmem>>, %arg3: memref<1x4x128xf32, #tpu.memory_space<vmem>>, %arg4: memref<1x4x128xf32, #tpu.memory_space<vmem>>, %arg5: memref<1x4x128xf32, #tpu.memory_space<vmem>>, %arg6: memref<1x4x128xf32, #tpu.memory_space<vmem>>) attributes {dimension_semantics = [#tpu.dimension_semantics<parallel>], iteration_bounds = array<i64: 2>, scalar_prefetch = 0 : i64, scratch_operands = 0 : i64, tpu.core_type = #tpu.core_type<tc>, window_params = [{pipeline_mode = #tpu.pipeline_mode<synchronous>, transform_indices = @transform_0, window_bounds = array<i64: 3, 4, 128>}, {transform_indices = @transform_1, window_bounds = array<i64: 1, 128, 128>}, {transform_indices = @transform_2, window_bounds = array<i64: 1, 4, 128>}, {transform_indices = @transform_3, window_bounds = array<i64: 1, 4, 128>}, {transform_indices = @transform_4, window_bounds = array<i64: 1, 4, 128>}, {transform_indices = @transform_5, window_bounds = array<i64: 1, 4, 128>}]} {
    %0 = tpu.iota {dimensions = array<i32: 1>} : vector<4x128xi32>
    %c32_i32 = arith.constant 32 : i32
    %1 = vector.broadcast %c32_i32 : i32 to vector<4x128xi32>
    %2 = arith.cmpi slt, %0, %1 : vector<4x128xi32>
    %3 = tpu.iota {dimensions = array<i32: 1>} : vector<4x128xi32>
    %c16_i32 = arith.constant 16 : i32
    %4 = vector.broadcast %c16_i32 : i32 to vector<4x128xi32>
    %5 = arith.cmpi slt, %3, %4 : vector<4x128xi32>
    %c0_i32 = arith.constant 0 : i32
    %6 = arith.index_cast %c0_i32 : i32 to index
    %c0 = arith.constant 0 : index
    %c0_0 = arith.constant 0 : index
    %7 = vector.load %arg3[%6, %c0, %c0_0] : memref<1x4x128xf32, #tpu.memory_space<vmem>>, vector<1x4x128xf32>
    %8 = vector.shape_cast %7 : vector<1x4x128xf32> to vector<4x128xf32>
    %9 = arith.index_cast %c0_i32 : i32 to index
    %c0_1 = arith.constant 0 : index
    %c0_2 = arith.constant 0 : index
    %10 = vector.load %arg4[%9, %c0_1, %c0_2] : memref<1x4x128xf32, #tpu.memory_space<vmem>>, vector<1x4x128xf32>
    %11 = vector.shape_cast %10 : vector<1x4x128xf32> to vector<4x128xf32>
    %c0_3 = arith.constant 0 : index
    %c0_4 = arith.constant 0 : index
    %c0_5 = arith.constant 0 : index
    %12 = vector.load %arg1[%c0_3, %c0_4, %c0_5] : memref<3x4x128xf32, #tpu.memory_space<vmem>>, vector<1x4x128xf32>
    %13 = vector.shape_cast %12 : vector<1x4x128xf32> to vector<4x128xf32>
    %14 = arith.index_cast %c0_i32 : i32 to index
    %c0_6 = arith.constant 0 : index
    %c0_7 = arith.constant 0 : index
    %15 = vector.load %arg2[%14, %c0_6, %c0_7] : memref<1x128x128xf32, #tpu.memory_space<vmem>>, vector<1x128x128xf32>
    %16 = vector.shape_cast %15 : vector<1x128x128xf32> to vector<128x128xf32>
    %cst = arith.constant dense<0.000000e+00> : vector<4x128xf32>
    %17 = tpu.matmul %8, %16, %cst {dimension_numbers = #tpu.dot_dimension_numbers<[1], [0], [0], [1], [0, 0, 1, 1], [], []>} : vector<4x128xf32>, vector<128x128xf32>, vector<4x128xf32> -> vector<4x128xf32>
    %18 = vector.extract_strided_slice %8 {offsets = [0, 0], sizes = [1, 128], strides = [1, 1]} : vector<4x128xf32> to vector<1x128xf32>
    %19 = vector.broadcast %18 : vector<1x128xf32> to vector<4x128xf32>
    %20 = arith.mulf %8, %19 : vector<4x128xf32>
    %cst_8 = arith.constant dense<0.000000e+00> : vector<4xf32>
    %21 = vector.multi_reduction <add>, %20, %cst_8 [1] : vector<4x128xf32> to vector<4xf32>
    %22 = vector.shape_cast %21 : vector<4xf32> to vector<4x1xf32>
    %23 = vector.extract_strided_slice %11 {offsets = [0, 0], sizes = [1, 128], strides = [1, 1]} : vector<4x128xf32> to vector<1x128xf32>
    %24 = vector.broadcast %22 : vector<4x1xf32> to vector<4x128xf32>
    %25 = vector.broadcast %23 : vector<1x128xf32> to vector<4x128xf32>
    %26 = arith.mulf %24, %25 : vector<4x128xf32>
    %27 = vector.extract_strided_slice %8 {offsets = [1, 0], sizes = [1, 128], strides = [1, 1]} : vector<4x128xf32> to vector<1x128xf32>
    %28 = vector.broadcast %27 : vector<1x128xf32> to vector<4x128xf32>
    %29 = arith.mulf %8, %28 : vector<4x128xf32>
    %cst_9 = arith.constant dense<0.000000e+00> : vector<4xf32>
    %30 = vector.multi_reduction <add>, %29, %cst_9 [1] : vector<4x128xf32> to vector<4xf32>
    %31 = vector.shape_cast %30 : vector<4xf32> to vector<4x1xf32>
    %32 = vector.extract_strided_slice %11 {offsets = [1, 0], sizes = [1, 128], strides = [1, 1]} : vector<4x128xf32> to vector<1x128xf32>
    %33 = vector.broadcast %31 : vector<4x1xf32> to vector<4x128xf32>
    %34 = vector.broadcast %32 : vector<1x128xf32> to vector<4x128xf32>
    %35 = arith.mulf %33, %34 : vector<4x128xf32>
    %36 = arith.addf %26, %35 : vector<4x128xf32>
    %37 = vector.extract_strided_slice %8 {offsets = [2, 0], sizes = [1, 128], strides = [1, 1]} : vector<4x128xf32> to vector<1x128xf32>
    %38 = vector.broadcast %37 : vector<1x128xf32> to vector<4x128xf32>
    %39 = arith.mulf %8, %38 : vector<4x128xf32>
    %cst_10 = arith.constant dense<0.000000e+00> : vector<4xf32>
    %40 = vector.multi_reduction <add>, %39, %cst_10 [1] : vector<4x128xf32> to vector<4xf32>
    %41 = vector.shape_cast %40 : vector<4xf32> to vector<4x1xf32>
    %42 = vector.extract_strided_slice %11 {offsets = [2, 0], sizes = [1, 128], strides = [1, 1]} : vector<4x128xf32> to vector<1x128xf32>
    %43 = vector.broadcast %41 : vector<4x1xf32> to vector<4x128xf32>
    %44 = vector.broadcast %42 : vector<1x128xf32> to vector<4x128xf32>
    %45 = arith.mulf %43, %44 : vector<4x128xf32>
    %46 = arith.addf %36, %45 : vector<4x128xf32>
    %47 = vector.extract_strided_slice %8 {offsets = [3, 0], sizes = [1, 128], strides = [1, 1]} : vector<4x128xf32> to vector<1x128xf32>
    %48 = vector.broadcast %47 : vector<1x128xf32> to vector<4x128xf32>
    %49 = arith.mulf %8, %48 : vector<4x128xf32>
    %cst_11 = arith.constant dense<0.000000e+00> : vector<4xf32>
    %50 = vector.multi_reduction <add>, %49, %cst_11 [1] : vector<4x128xf32> to vector<4xf32>
    %51 = vector.shape_cast %50 : vector<4xf32> to vector<4x1xf32>
    %52 = vector.extract_strided_slice %11 {offsets = [3, 0], sizes = [1, 128], strides = [1, 1]} : vector<4x128xf32> to vector<1x128xf32>
    %53 = vector.broadcast %51 : vector<4x1xf32> to vector<4x128xf32>
    %54 = vector.broadcast %52 : vector<1x128xf32> to vector<4x128xf32>
    %55 = arith.mulf %53, %54 : vector<4x128xf32>
    %56 = arith.addf %46, %55 : vector<4x128xf32>
    %57 = arith.divf %17, %56 : vector<4x128xf32>
    %58 = arith.mulf %11, %57 : vector<4x128xf32>
    %cst_12 = arith.constant 0.000000e+00 : f32
    %59 = vector.broadcast %cst_12 : f32 to vector<4x128xf32>
    %60 = arith.select %2, %58, %59 : vector<4x128xi1>, vector<4x128xf32>
    %cst_13 = arith.constant dense<0.000000e+00> : vector<4x128xf32>
    %61 = tpu.matmul %60, %16, %cst_13 {dimension_numbers = #tpu.dot_dimension_numbers<[1], [1], [0], [0], [0, 0, 1, 0], [], []>} : vector<4x128xf32>, vector<128x128xf32>, vector<4x128xf32> -> vector<4x128xf32>
    %62 = vector.extract_strided_slice %60 {offsets = [0, 0], sizes = [1, 128], strides = [1, 1]} : vector<4x128xf32> to vector<1x128xf32>
    %63 = vector.broadcast %62 : vector<1x128xf32> to vector<4x128xf32>
    %64 = arith.mulf %60, %63 : vector<4x128xf32>
    %cst_14 = arith.constant dense<0.000000e+00> : vector<4xf32>
    %65 = vector.multi_reduction <add>, %64, %cst_14 [1] : vector<4x128xf32> to vector<4xf32>
    %66 = vector.shape_cast %65 : vector<4xf32> to vector<4x1xf32>
    %67 = vector.extract_strided_slice %8 {offsets = [0, 0], sizes = [1, 128], strides = [1, 1]} : vector<4x128xf32> to vector<1x128xf32>
    %68 = vector.broadcast %66 : vector<4x1xf32> to vector<4x128xf32>
    %69 = vector.broadcast %67 : vector<1x128xf32> to vector<4x128xf32>
    %70 = arith.mulf %68, %69 : vector<4x128xf32>
    %71 = vector.extract_strided_slice %60 {offsets = [1, 0], sizes = [1, 128], strides = [1, 1]} : vector<4x128xf32> to vector<1x128xf32>
    %72 = vector.broadcast %71 : vector<1x128xf32> to vector<4x128xf32>
    %73 = arith.mulf %60, %72 : vector<4x128xf32>
    %cst_15 = arith.constant dense<0.000000e+00> : vector<4xf32>
    %74 = vector.multi_reduction <add>, %73, %cst_15 [1] : vector<4x128xf32> to vector<4xf32>
    %75 = vector.shape_cast %74 : vector<4xf32> to vector<4x1xf32>
    %76 = vector.extract_strided_slice %8 {offsets = [1, 0], sizes = [1, 128], strides = [1, 1]} : vector<4x128xf32> to vector<1x128xf32>
    %77 = vector.broadcast %75 : vector<4x1xf32> to vector<4x128xf32>
    %78 = vector.broadcast %76 : vector<1x128xf32> to vector<4x128xf32>
    %79 = arith.mulf %77, %78 : vector<4x128xf32>
    %80 = arith.addf %70, %79 : vector<4x128xf32>
    %81 = vector.extract_strided_slice %60 {offsets = [2, 0], sizes = [1, 128], strides = [1, 1]} : vector<4x128xf32> to vector<1x128xf32>
    %82 = vector.broadcast %81 : vector<1x128xf32> to vector<4x128xf32>
    %83 = arith.mulf %60, %82 : vector<4x128xf32>
    %cst_16 = arith.constant dense<0.000000e+00> : vector<4xf32>
    %84 = vector.multi_reduction <add>, %83, %cst_16 [1] : vector<4x128xf32> to vector<4xf32>
    %85 = vector.shape_cast %84 : vector<4xf32> to vector<4x1xf32>
    %86 = vector.extract_strided_slice %8 {offsets = [2, 0], sizes = [1, 128], strides = [1, 1]} : vector<4x128xf32> to vector<1x128xf32>
    %87 = vector.broadcast %85 : vector<4x1xf32> to vector<4x128xf32>
    %88 = vector.broadcast %86 : vector<1x128xf32> to vector<4x128xf32>
    %89 = arith.mulf %87, %88 : vector<4x128xf32>
    %90 = arith.addf %80, %89 : vector<4x128xf32>
    %91 = vector.extract_strided_slice %60 {offsets = [3, 0], sizes = [1, 128], strides = [1, 1]} : vector<4x128xf32> to vector<1x128xf32>
    %92 = vector.broadcast %91 : vector<1x128xf32> to vector<4x128xf32>
    %93 = arith.mulf %60, %92 : vector<4x128xf32>
    %cst_17 = arith.constant dense<0.000000e+00> : vector<4xf32>
    %94 = vector.multi_reduction <add>, %93, %cst_17 [1] : vector<4x128xf32> to vector<4xf32>
    %95 = vector.shape_cast %94 : vector<4xf32> to vector<4x1xf32>
    %96 = vector.extract_strided_slice %8 {offsets = [3, 0], sizes = [1, 128], strides = [1, 1]} : vector<4x128xf32> to vector<1x128xf32>
    %97 = vector.broadcast %95 : vector<4x1xf32> to vector<4x128xf32>
    %98 = vector.broadcast %96 : vector<1x128xf32> to vector<4x128xf32>
    %99 = arith.mulf %97, %98 : vector<4x128xf32>
    %100 = arith.addf %90, %99 : vector<4x128xf32>
    %101 = arith.divf %61, %100 : vector<4x128xf32>
    %102 = arith.mulf %13, %101 : vector<4x128xf32>
    %103 = arith.mulf %8, %102 : vector<4x128xf32>
    %cst_18 = arith.constant 0.000000e+00 : f32
    %104 = vector.broadcast %cst_18 : f32 to vector<4x128xf32>
    %105 = arith.select %5, %103, %104 : vector<4x128xi1>, vector<4x128xf32>
    %c1 = arith.constant 1 : index
    %c0_19 = arith.constant 0 : index
    %c0_20 = arith.constant 0 : index
    %106 = vector.load %arg1[%c1, %c0_19, %c0_20] : memref<3x4x128xf32, #tpu.memory_space<vmem>>, vector<1x4x128xf32>
    %107 = vector.shape_cast %106 : vector<1x4x128xf32> to vector<4x128xf32>
    %108 = arith.index_cast %c0_i32 : i32 to index
    %c0_21 = arith.constant 0 : index
    %c0_22 = arith.constant 0 : index
    %109 = vector.load %arg2[%108, %c0_21, %c0_22] : memref<1x128x128xf32, #tpu.memory_space<vmem>>, vector<1x128x128xf32>
    %110 = vector.shape_cast %109 : vector<1x128x128xf32> to vector<128x128xf32>
    %cst_23 = arith.constant dense<0.000000e+00> : vector<4x128xf32>
    %111 = tpu.matmul %105, %110, %cst_23 {dimension_numbers = #tpu.dot_dimension_numbers<[1], [0], [0], [1], [0, 0, 1, 1], [], []>} : vector<4x128xf32>, vector<128x128xf32>, vector<4x128xf32> -> vector<4x128xf32>
    %112 = vector.extract_strided_slice %105 {offsets = [0, 0], sizes = [1, 128], strides = [1, 1]} : vector<4x128xf32> to vector<1x128xf32>
    %113 = vector.broadcast %112 : vector<1x128xf32> to vector<4x128xf32>
    %114 = arith.mulf %105, %113 : vector<4x128xf32>
    %cst_24 = arith.constant dense<0.000000e+00> : vector<4xf32>
    %115 = vector.multi_reduction <add>, %114, %cst_24 [1] : vector<4x128xf32> to vector<4xf32>
    %116 = vector.shape_cast %115 : vector<4xf32> to vector<4x1xf32>
    %117 = vector.extract_strided_slice %60 {offsets = [0, 0], sizes = [1, 128], strides = [1, 1]} : vector<4x128xf32> to vector<1x128xf32>
    %118 = vector.broadcast %116 : vector<4x1xf32> to vector<4x128xf32>
    %119 = vector.broadcast %117 : vector<1x128xf32> to vector<4x128xf32>
    %120 = arith.mulf %118, %119 : vector<4x128xf32>
    %121 = vector.extract_strided_slice %105 {offsets = [1, 0], sizes = [1, 128], strides = [1, 1]} : vector<4x128xf32> to vector<1x128xf32>
    %122 = vector.broadcast %121 : vector<1x128xf32> to vector<4x128xf32>
    %123 = arith.mulf %105, %122 : vector<4x128xf32>
    %cst_25 = arith.constant dense<0.000000e+00> : vector<4xf32>
    %124 = vector.multi_reduction <add>, %123, %cst_25 [1] : vector<4x128xf32> to vector<4xf32>
    %125 = vector.shape_cast %124 : vector<4xf32> to vector<4x1xf32>
    %126 = vector.extract_strided_slice %60 {offsets = [1, 0], sizes = [1, 128], strides = [1, 1]} : vector<4x128xf32> to vector<1x128xf32>
    %127 = vector.broadcast %125 : vector<4x1xf32> to vector<4x128xf32>
    %128 = vector.broadcast %126 : vector<1x128xf32> to vector<4x128xf32>
    %129 = arith.mulf %127, %128 : vector<4x128xf32>
    %130 = arith.addf %120, %129 : vector<4x128xf32>
    %131 = vector.extract_strided_slice %105 {offsets = [2, 0], sizes = [1, 128], strides = [1, 1]} : vector<4x128xf32> to vector<1x128xf32>
    %132 = vector.broadcast %131 : vector<1x128xf32> to vector<4x128xf32>
    %133 = arith.mulf %105, %132 : vector<4x128xf32>
    %cst_26 = arith.constant dense<0.000000e+00> : vector<4xf32>
    %134 = vector.multi_reduction <add>, %133, %cst_26 [1] : vector<4x128xf32> to vector<4xf32>
    %135 = vector.shape_cast %134 : vector<4xf32> to vector<4x1xf32>
    %136 = vector.extract_strided_slice %60 {offsets = [2, 0], sizes = [1, 128], strides = [1, 1]} : vector<4x128xf32> to vector<1x128xf32>
    %137 = vector.broadcast %135 : vector<4x1xf32> to vector<4x128xf32>
    %138 = vector.broadcast %136 : vector<1x128xf32> to vector<4x128xf32>
    %139 = arith.mulf %137, %138 : vector<4x128xf32>
    %140 = arith.addf %130, %139 : vector<4x128xf32>
    %141 = vector.extract_strided_slice %105 {offsets = [3, 0], sizes = [1, 128], strides = [1, 1]} : vector<4x128xf32> to vector<1x128xf32>
    %142 = vector.broadcast %141 : vector<1x128xf32> to vector<4x128xf32>
    %143 = arith.mulf %105, %142 : vector<4x128xf32>
    %cst_27 = arith.constant dense<0.000000e+00> : vector<4xf32>
    %144 = vector.multi_reduction <add>, %143, %cst_27 [1] : vector<4x128xf32> to vector<4xf32>
    %145 = vector.shape_cast %144 : vector<4xf32> to vector<4x1xf32>
    %146 = vector.extract_strided_slice %60 {offsets = [3, 0], sizes = [1, 128], strides = [1, 1]} : vector<4x128xf32> to vector<1x128xf32>
    %147 = vector.broadcast %145 : vector<4x1xf32> to vector<4x128xf32>
    %148 = vector.broadcast %146 : vector<1x128xf32> to vector<4x128xf32>
    %149 = arith.mulf %147, %148 : vector<4x128xf32>
    %150 = arith.addf %140, %149 : vector<4x128xf32>
    %151 = arith.divf %111, %150 : vector<4x128xf32>
    %152 = arith.mulf %60, %151 : vector<4x128xf32>
    %cst_28 = arith.constant 0.000000e+00 : f32
    %153 = vector.broadcast %cst_28 : f32 to vector<4x128xf32>
    %154 = arith.select %2, %152, %153 : vector<4x128xi1>, vector<4x128xf32>
    %cst_29 = arith.constant dense<0.000000e+00> : vector<4x128xf32>
    %155 = tpu.matmul %154, %110, %cst_29 {dimension_numbers = #tpu.dot_dimension_numbers<[1], [1], [0], [0], [0, 0, 1, 0], [], []>} : vector<4x128xf32>, vector<128x128xf32>, vector<4x128xf32> -> vector<4x128xf32>
    %156 = vector.extract_strided_slice %154 {offsets = [0, 0], sizes = [1, 128], strides = [1, 1]} : vector<4x128xf32> to vector<1x128xf32>
    %157 = vector.broadcast %156 : vector<1x128xf32> to vector<4x128xf32>
    %158 = arith.mulf %154, %157 : vector<4x128xf32>
    %cst_30 = arith.constant dense<0.000000e+00> : vector<4xf32>
    %159 = vector.multi_reduction <add>, %158, %cst_30 [1] : vector<4x128xf32> to vector<4xf32>
    %160 = vector.shape_cast %159 : vector<4xf32> to vector<4x1xf32>
    %161 = vector.extract_strided_slice %105 {offsets = [0, 0], sizes = [1, 128], strides = [1, 1]} : vector<4x128xf32> to vector<1x128xf32>
    %162 = vector.broadcast %160 : vector<4x1xf32> to vector<4x128xf32>
    %163 = vector.broadcast %161 : vector<1x128xf32> to vector<4x128xf32>
    %164 = arith.mulf %162, %163 : vector<4x128xf32>
    %165 = vector.extract_strided_slice %154 {offsets = [1, 0], sizes = [1, 128], strides = [1, 1]} : vector<4x128xf32> to vector<1x128xf32>
    %166 = vector.broadcast %165 : vector<1x128xf32> to vector<4x128xf32>
    %167 = arith.mulf %154, %166 : vector<4x128xf32>
    %cst_31 = arith.constant dense<0.000000e+00> : vector<4xf32>
    %168 = vector.multi_reduction <add>, %167, %cst_31 [1] : vector<4x128xf32> to vector<4xf32>
    %169 = vector.shape_cast %168 : vector<4xf32> to vector<4x1xf32>
    %170 = vector.extract_strided_slice %105 {offsets = [1, 0], sizes = [1, 128], strides = [1, 1]} : vector<4x128xf32> to vector<1x128xf32>
    %171 = vector.broadcast %169 : vector<4x1xf32> to vector<4x128xf32>
    %172 = vector.broadcast %170 : vector<1x128xf32> to vector<4x128xf32>
    %173 = arith.mulf %171, %172 : vector<4x128xf32>
    %174 = arith.addf %164, %173 : vector<4x128xf32>
    %175 = vector.extract_strided_slice %154 {offsets = [2, 0], sizes = [1, 128], strides = [1, 1]} : vector<4x128xf32> to vector<1x128xf32>
    %176 = vector.broadcast %175 : vector<1x128xf32> to vector<4x128xf32>
    %177 = arith.mulf %154, %176 : vector<4x128xf32>
    %cst_32 = arith.constant dense<0.000000e+00> : vector<4xf32>
    %178 = vector.multi_reduction <add>, %177, %cst_32 [1] : vector<4x128xf32> to vector<4xf32>
    %179 = vector.shape_cast %178 : vector<4xf32> to vector<4x1xf32>
    %180 = vector.extract_strided_slice %105 {offsets = [2, 0], sizes = [1, 128], strides = [1, 1]} : vector<4x128xf32> to vector<1x128xf32>
    %181 = vector.broadcast %179 : vector<4x1xf32> to vector<4x128xf32>
    %182 = vector.broadcast %180 : vector<1x128xf32> to vector<4x128xf32>
    %183 = arith.mulf %181, %182 : vector<4x128xf32>
    %184 = arith.addf %174, %183 : vector<4x128xf32>
    %185 = vector.extract_strided_slice %154 {offsets = [3, 0], sizes = [1, 128], strides = [1, 1]} : vector<4x128xf32> to vector<1x128xf32>
    %186 = vector.broadcast %185 : vector<1x128xf32> to vector<4x128xf32>
    %187 = arith.mulf %154, %186 : vector<4x128xf32>
    %cst_33 = arith.constant dense<0.000000e+00> : vector<4xf32>
    %188 = vector.multi_reduction <add>, %187, %cst_33 [1] : vector<4x128xf32> to vector<4xf32>
    %189 = vector.shape_cast %188 : vector<4xf32> to vector<4x1xf32>
    %190 = vector.extract_strided_slice %105 {offsets = [3, 0], sizes = [1, 128], strides = [1, 1]} : vector<4x128xf32> to vector<1x128xf32>
    %191 = vector.broadcast %189 : vector<4x1xf32> to vector<4x128xf32>
    %192 = vector.broadcast %190 : vector<1x128xf32> to vector<4x128xf32>
    %193 = arith.mulf %191, %192 : vector<4x128xf32>
    %194 = arith.addf %184, %193 : vector<4x128xf32>
    %195 = arith.divf %155, %194 : vector<4x128xf32>
    %196 = arith.mulf %107, %195 : vector<4x128xf32>
    %197 = arith.mulf %105, %196 : vector<4x128xf32>
    %cst_34 = arith.constant 0.000000e+00 : f32
    %198 = vector.broadcast %cst_34 : f32 to vector<4x128xf32>
    %199 = arith.select %5, %197, %198 : vector<4x128xi1>, vector<4x128xf32>
    %c2 = arith.constant 2 : index
    %c0_35 = arith.constant 0 : index
    %c0_36 = arith.constant 0 : index
    %200 = vector.load %arg1[%c2, %c0_35, %c0_36] : memref<3x4x128xf32, #tpu.memory_space<vmem>>, vector<1x4x128xf32>
    %201 = vector.shape_cast %200 : vector<1x4x128xf32> to vector<4x128xf32>
    %202 = arith.index_cast %c0_i32 : i32 to index
    %c0_37 = arith.constant 0 : index
    %c0_38 = arith.constant 0 : index
    %203 = vector.load %arg2[%202, %c0_37, %c0_38] : memref<1x128x128xf32, #tpu.memory_space<vmem>>, vector<1x128x128xf32>
    %204 = vector.shape_cast %203 : vector<1x128x128xf32> to vector<128x128xf32>
    %cst_39 = arith.constant dense<0.000000e+00> : vector<4x128xf32>
    %205 = tpu.matmul %199, %204, %cst_39 {dimension_numbers = #tpu.dot_dimension_numbers<[1], [0], [0], [1], [0, 0, 1, 1], [], []>} : vector<4x128xf32>, vector<128x128xf32>, vector<4x128xf32> -> vector<4x128xf32>
    %206 = vector.extract_strided_slice %199 {offsets = [0, 0], sizes = [1, 128], strides = [1, 1]} : vector<4x128xf32> to vector<1x128xf32>
    %207 = vector.broadcast %206 : vector<1x128xf32> to vector<4x128xf32>
    %208 = arith.mulf %199, %207 : vector<4x128xf32>
    %cst_40 = arith.constant dense<0.000000e+00> : vector<4xf32>
    %209 = vector.multi_reduction <add>, %208, %cst_40 [1] : vector<4x128xf32> to vector<4xf32>
    %210 = vector.shape_cast %209 : vector<4xf32> to vector<4x1xf32>
    %211 = vector.extract_strided_slice %154 {offsets = [0, 0], sizes = [1, 128], strides = [1, 1]} : vector<4x128xf32> to vector<1x128xf32>
    %212 = vector.broadcast %210 : vector<4x1xf32> to vector<4x128xf32>
    %213 = vector.broadcast %211 : vector<1x128xf32> to vector<4x128xf32>
    %214 = arith.mulf %212, %213 : vector<4x128xf32>
    %215 = vector.extract_strided_slice %199 {offsets = [1, 0], sizes = [1, 128], strides = [1, 1]} : vector<4x128xf32> to vector<1x128xf32>
    %216 = vector.broadcast %215 : vector<1x128xf32> to vector<4x128xf32>
    %217 = arith.mulf %199, %216 : vector<4x128xf32>
    %cst_41 = arith.constant dense<0.000000e+00> : vector<4xf32>
    %218 = vector.multi_reduction <add>, %217, %cst_41 [1] : vector<4x128xf32> to vector<4xf32>
    %219 = vector.shape_cast %218 : vector<4xf32> to vector<4x1xf32>
    %220 = vector.extract_strided_slice %154 {offsets = [1, 0], sizes = [1, 128], strides = [1, 1]} : vector<4x128xf32> to vector<1x128xf32>
    %221 = vector.broadcast %219 : vector<4x1xf32> to vector<4x128xf32>
    %222 = vector.broadcast %220 : vector<1x128xf32> to vector<4x128xf32>
    %223 = arith.mulf %221, %222 : vector<4x128xf32>
    %224 = arith.addf %214, %223 : vector<4x128xf32>
    %225 = vector.extract_strided_slice %199 {offsets = [2, 0], sizes = [1, 128], strides = [1, 1]} : vector<4x128xf32> to vector<1x128xf32>
    %226 = vector.broadcast %225 : vector<1x128xf32> to vector<4x128xf32>
    %227 = arith.mulf %199, %226 : vector<4x128xf32>
    %cst_42 = arith.constant dense<0.000000e+00> : vector<4xf32>
    %228 = vector.multi_reduction <add>, %227, %cst_42 [1] : vector<4x128xf32> to vector<4xf32>
    %229 = vector.shape_cast %228 : vector<4xf32> to vector<4x1xf32>
    %230 = vector.extract_strided_slice %154 {offsets = [2, 0], sizes = [1, 128], strides = [1, 1]} : vector<4x128xf32> to vector<1x128xf32>
    %231 = vector.broadcast %229 : vector<4x1xf32> to vector<4x128xf32>
    %232 = vector.broadcast %230 : vector<1x128xf32> to vector<4x128xf32>
    %233 = arith.mulf %231, %232 : vector<4x128xf32>
    %234 = arith.addf %224, %233 : vector<4x128xf32>
    %235 = vector.extract_strided_slice %199 {offsets = [3, 0], sizes = [1, 128], strides = [1, 1]} : vector<4x128xf32> to vector<1x128xf32>
    %236 = vector.broadcast %235 : vector<1x128xf32> to vector<4x128xf32>
    %237 = arith.mulf %199, %236 : vector<4x128xf32>
    %cst_43 = arith.constant dense<0.000000e+00> : vector<4xf32>
    %238 = vector.multi_reduction <add>, %237, %cst_43 [1] : vector<4x128xf32> to vector<4xf32>
    %239 = vector.shape_cast %238 : vector<4xf32> to vector<4x1xf32>
    %240 = vector.extract_strided_slice %154 {offsets = [3, 0], sizes = [1, 128], strides = [1, 1]} : vector<4x128xf32> to vector<1x128xf32>
    %241 = vector.broadcast %239 : vector<4x1xf32> to vector<4x128xf32>
    %242 = vector.broadcast %240 : vector<1x128xf32> to vector<4x128xf32>
    %243 = arith.mulf %241, %242 : vector<4x128xf32>
    %244 = arith.addf %234, %243 : vector<4x128xf32>
    %245 = arith.divf %205, %244 : vector<4x128xf32>
    %246 = arith.mulf %154, %245 : vector<4x128xf32>
    %cst_44 = arith.constant 0.000000e+00 : f32
    %247 = vector.broadcast %cst_44 : f32 to vector<4x128xf32>
    %248 = arith.select %2, %246, %247 : vector<4x128xi1>, vector<4x128xf32>
    %cst_45 = arith.constant dense<0.000000e+00> : vector<4x128xf32>
    %249 = tpu.matmul %248, %204, %cst_45 {dimension_numbers = #tpu.dot_dimension_numbers<[1], [1], [0], [0], [0, 0, 1, 0], [], []>} : vector<4x128xf32>, vector<128x128xf32>, vector<4x128xf32> -> vector<4x128xf32>
    %250 = vector.extract_strided_slice %248 {offsets = [0, 0], sizes = [1, 128], strides = [1, 1]} : vector<4x128xf32> to vector<1x128xf32>
    %251 = vector.broadcast %250 : vector<1x128xf32> to vector<4x128xf32>
    %252 = arith.mulf %248, %251 : vector<4x128xf32>
    %cst_46 = arith.constant dense<0.000000e+00> : vector<4xf32>
    %253 = vector.multi_reduction <add>, %252, %cst_46 [1] : vector<4x128xf32> to vector<4xf32>
    %254 = vector.shape_cast %253 : vector<4xf32> to vector<4x1xf32>
    %255 = vector.extract_strided_slice %199 {offsets = [0, 0], sizes = [1, 128], strides = [1, 1]} : vector<4x128xf32> to vector<1x128xf32>
    %256 = vector.broadcast %254 : vector<4x1xf32> to vector<4x128xf32>
    %257 = vector.broadcast %255 : vector<1x128xf32> to vector<4x128xf32>
    %258 = arith.mulf %256, %257 : vector<4x128xf32>
    %259 = vector.extract_strided_slice %248 {offsets = [1, 0], sizes = [1, 128], strides = [1, 1]} : vector<4x128xf32> to vector<1x128xf32>
    %260 = vector.broadcast %259 : vector<1x128xf32> to vector<4x128xf32>
    %261 = arith.mulf %248, %260 : vector<4x128xf32>
    %cst_47 = arith.constant dense<0.000000e+00> : vector<4xf32>
    %262 = vector.multi_reduction <add>, %261, %cst_47 [1] : vector<4x128xf32> to vector<4xf32>
    %263 = vector.shape_cast %262 : vector<4xf32> to vector<4x1xf32>
    %264 = vector.extract_strided_slice %199 {offsets = [1, 0], sizes = [1, 128], strides = [1, 1]} : vector<4x128xf32> to vector<1x128xf32>
    %265 = vector.broadcast %263 : vector<4x1xf32> to vector<4x128xf32>
    %266 = vector.broadcast %264 : vector<1x128xf32> to vector<4x128xf32>
    %267 = arith.mulf %265, %266 : vector<4x128xf32>
    %268 = arith.addf %258, %267 : vector<4x128xf32>
    %269 = vector.extract_strided_slice %248 {offsets = [2, 0], sizes = [1, 128], strides = [1, 1]} : vector<4x128xf32> to vector<1x128xf32>
    %270 = vector.broadcast %269 : vector<1x128xf32> to vector<4x128xf32>
    %271 = arith.mulf %248, %270 : vector<4x128xf32>
    %cst_48 = arith.constant dense<0.000000e+00> : vector<4xf32>
    %272 = vector.multi_reduction <add>, %271, %cst_48 [1] : vector<4x128xf32> to vector<4xf32>
    %273 = vector.shape_cast %272 : vector<4xf32> to vector<4x1xf32>
    %274 = vector.extract_strided_slice %199 {offsets = [2, 0], sizes = [1, 128], strides = [1, 1]} : vector<4x128xf32> to vector<1x128xf32>
    %275 = vector.broadcast %273 : vector<4x1xf32> to vector<4x128xf32>
    %276 = vector.broadcast %274 : vector<1x128xf32> to vector<4x128xf32>
    %277 = arith.mulf %275, %276 : vector<4x128xf32>
    %278 = arith.addf %268, %277 : vector<4x128xf32>
    %279 = vector.extract_strided_slice %248 {offsets = [3, 0], sizes = [1, 128], strides = [1, 1]} : vector<4x128xf32> to vector<1x128xf32>
    %280 = vector.broadcast %279 : vector<1x128xf32> to vector<4x128xf32>
    %281 = arith.mulf %248, %280 : vector<4x128xf32>
    %cst_49 = arith.constant dense<0.000000e+00> : vector<4xf32>
    %282 = vector.multi_reduction <add>, %281, %cst_49 [1] : vector<4x128xf32> to vector<4xf32>
    %283 = vector.shape_cast %282 : vector<4xf32> to vector<4x1xf32>
    %284 = vector.extract_strided_slice %199 {offsets = [3, 0], sizes = [1, 128], strides = [1, 1]} : vector<4x128xf32> to vector<1x128xf32>
    %285 = vector.broadcast %283 : vector<4x1xf32> to vector<4x128xf32>
    %286 = vector.broadcast %284 : vector<1x128xf32> to vector<4x128xf32>
    %287 = arith.mulf %285, %286 : vector<4x128xf32>
    %288 = arith.addf %278, %287 : vector<4x128xf32>
    %289 = arith.divf %249, %288 : vector<4x128xf32>
    %290 = arith.mulf %201, %289 : vector<4x128xf32>
    %291 = arith.mulf %199, %290 : vector<4x128xf32>
    %cst_50 = arith.constant 0.000000e+00 : f32
    %292 = vector.broadcast %cst_50 : f32 to vector<4x128xf32>
    %293 = arith.select %5, %291, %292 : vector<4x128xi1>, vector<4x128xf32>
    %294 = arith.index_cast %c0_i32 : i32 to index
    %c0_51 = arith.constant 0 : index
    %c0_52 = arith.constant 0 : index
    %295 = vector.load %arg5[%294, %c0_51, %c0_52] : memref<1x4x128xf32, #tpu.memory_space<vmem>>, vector<1x4x128xf32>
    %296 = vector.shape_cast %295 : vector<1x4x128xf32> to vector<4x128xf32>
    %297 = vector.shape_cast %248 : vector<4x128xf32> to vector<1x4x128xf32>
    tpu.vector_store %arg5[%294, %c0_51, %c0_52], %297 {strides = array<i32>} : memref<1x4x128xf32, #tpu.memory_space<vmem>>, vector<1x4x128xf32>,
    %298 = arith.index_cast %c0_i32 : i32 to index
    %c0_53 = arith.constant 0 : index
    %c0_54 = arith.constant 0 : index
    %299 = vector.load %arg6[%298, %c0_53, %c0_54] : memref<1x4x128xf32, #tpu.memory_space<vmem>>, vector<1x4x128xf32>
    %300 = vector.shape_cast %299 : vector<1x4x128xf32> to vector<4x128xf32>
    %301 = vector.shape_cast %293 : vector<4x128xf32> to vector<1x4x128xf32>
    tpu.vector_store %arg6[%298, %c0_53, %c0_54], %301 {strides = array<i32>} : memref<1x4x128xf32, #tpu.memory_space<vmem>>, vector<1x4x128xf32>,
    %c1_i32 = arith.constant 1 : i32
    return
  }
  func.func @transform_0(%arg0: i32) -> (i32, i32, i32) {
    %c0_i32 = arith.constant 0 : i32
    %c0_i32_0 = arith.constant 0 : i32
    %c0_i32_1 = arith.constant 0 : i32
    %c0_i32_2 = arith.constant 0 : i32
    return %c0_i32, %c0_i32_0, %c0_i32_1 : i32, i32, i32
  }
  func.func @transform_1(%arg0: i32) -> (i32, i32, i32) {
    %c0_i32 = arith.constant 0 : i32
    %c0_i32_0 = arith.constant 0 : i32
    %c0_i32_1 = arith.constant 0 : i32
    return %arg0, %c0_i32, %c0_i32_0 : i32, i32, i32
  }
  func.func @transform_2(%arg0: i32) -> (i32, i32, i32) {
    %c0_i32 = arith.constant 0 : i32
    %c0_i32_0 = arith.constant 0 : i32
    %c0_i32_1 = arith.constant 0 : i32
    return %arg0, %c0_i32, %c0_i32_0 : i32, i32, i32
  }
  func.func @transform_3(%arg0: i32) -> (i32, i32, i32) {
    %c0_i32 = arith.constant 0 : i32
    %c0_i32_0 = arith.constant 0 : i32
    %c0_i32_1 = arith.constant 0 : i32
    return %arg0, %c0_i32, %c0_i32_0 : i32, i32, i32
  }
  func.func @transform_4(%arg0: i32) -> (i32, i32, i32) {
    %c0_i32 = arith.constant 0 : i32
    %c0_i32_0 = arith.constant 0 : i32
    %c0_i32_1 = arith.constant 0 : i32
    return %arg0, %c0_i32, %c0_i32_0 : i32, i32, i32
  }
  func.func @transform_5(%arg0: i32) -> (i32, i32, i32) {
    %c0_i32 = arith.constant 0 : i32
    %c0_i32_0 = arith.constant 0 : i32
    %c0_i32_1 = arith.constant 0 : i32
    return %arg0, %c0_i32, %c0_i32_0 : i32, i32, i32
  }
}

</mosaic_0001>

<bundles_post_ra>
// kernel: tpu_custom_call.1
= control target key start
LH: loop header
LB: loop body
LE: loop exit
PB: predicated region body
PF: predicated region fallthrough
CT: control target
= control target key end

     0   :  { %s1861_s0 = inlined_call_operand.hbm [shape: f32[3,4,128], index: 0, kind: input, shape index: {}]   ;;  %s1862_s1 = inlined_call_operand.hbm [shape: f32[2,128,128], index: 1, kind: input, shape index: {}]   ;;  %s1863_s2 = inlined_call_operand.hbm [shape: f32[2,4,128], index: 2, kind: input, shape index: {}]   ;;  %s1864_s3 = inlined_call_operand.hbm [shape: f32[2,4,128], index: 3, kind: input, shape index: {}]   ;;  %s1865_s4 = inlined_call_operand.hbm [shape: f32[2,4,128], index: 4, kind: output, shape index: {0}]   ;;  %s1866_s5 = inlined_call_operand.hbm [shape: f32[2,4,128], index: 5, kind: output, shape index: {1}]  }
   0x1   :  { %1870 = sst [smem:[#allocation21_spill]] %s1861_s0 }
   0x2   :  { %1871 = sst [smem:[#allocation22_spill]] %s1862_s1 }
   0x3   :  { %11 = vsyncpa [#allocation3], 0 }
   0x4   :  { %12 = vsyncpa [#allocation6], 0 }
   0x5   :  { %14 = vsyncpa [#allocation6 + $0x1], 0 }
   0x6   :  { %15 = vsyncpa [#allocation9], 0 }
   0x7   :  { %17 = vsyncpa [#allocation9 + $0x1], 0 }
   0x8   :  { %18 = vsyncpa [#allocation4], 0 }
   0x9   :  { %20 = vsyncpa [#allocation4 + $0x1], 0 }
   0xa   :  { %21 = vsyncpa [#allocation12], 0 }
   0xb   :  { %23 = vsyncpa [#allocation12 + $0x1], 0  ;;  %s1343_s18 = smov 0   ;;  %s1345_s19 = smov 0  }
   0xc   :  { %s1347_s20 = smov 0   ;;  %s1349_s21 = smov 0  }
   0xd LB: > { %1872 = sst [smem:[#allocation18_spill]] %s1302_s20  ;;  %s1364_s22 = sadd.s32 1, %s1306_s21   ;;  %s1306_s21 = sphi %s1349_s21, %s1883_s21   ;;  %s1302_s20 = sphi %s1347_s20, %s1885_s20   ;;  %s1298_s19 = sphi %s1345_s19, %s1887_s19   ;;  %s1294_s18 = sphi %s1343_s18, %s1886_s18  }
   0xe   : > { %1873 = sst [smem:[#allocation19_spill]] %s1364_s22  ;;  %s57_s23 = sadd.s32 1, %s1302_s20 }
   0xf   : > { %s54_s24 = ssub.s32 %s1306_s21, %s1364_s22  ;;  %p64_p0 = scmp.ne.s32.totalorder %s1302_s20, %s1298_s19 }
  0x10   : > { %p55_p1 = scmp.eq.s32.totalorder %s54_s24, 0  ;;  %p65_p2 = scmp.eq.s32.totalorder %s1306_s21, 0 }
  0x11   : > { %p1028_p4 = scmp.lt.s32.totalorder %s1306_s21, 2  ;;  %s212_s26 = sand.u32 1, %s1306_s21  }
  0x12   : > { %s1375_s25 = scalar_select %p55_p1, %s1302_s20, %s57_s23  }
  0x13   : > { %p66_p5 = por %p65_p2, %p64_p0  ;;  %s1382_s27 = sand.u32 1, %s1302_s20  }
  0x14   : > { %1874 = sst [smem:[#allocation20_spill]] %s1375_s25  ;;  %s966_s28 = sshll.u32 %s1382_s27, 7 }
  0x15   : > { %s991_s29 = sshll.u32 %s1306_s21, 7  ;;  %s1875_s1 = sld [smem:[#allocation22_spill]] }
  0x16   : > { %s216_s9 = scalar_lea.vmem [#allocation5], %s966_s28  ;;  %p1391_p6 = pnand %p1028_p4, %p66_p5 }
  0x17   : > { %s224_s10 = sshll.u32 %s216_s9, 4  ;;  %s1395_s12 = scalar_lea.sflag [#allocation6], %s212_s26  ;;  %s225_s10 = int_to_ptr.vmem [resolvable:$true] %s224_s10 }
  0x18   : > { %p1084_p8 = pneg %p1391_p6 }
  0x1b   : > { %s221_s7 = scalar_lea.hbm %s1875_s1, %s991_s29  ;;  %s1087_s17 = scalar_lea.hbm %s1875_s1, 256 }
  0x1c   : > { %s222_s8 = sshll.u32 %s221_s7, 4  ;;  %s223_s8 = int_to_ptr.hbm [resolvable:$true] %s222_s8 }
  0x1d   : > { %s1080_s13 = sshra.s32 %s223_s8, 4  ;;  %s1081_s13 = int_to_ptr.hbm [resolvable:$true] %s1080_s13 }
  0x1e   : > { %s1082_s14 = scalar_lea.hbm %s1081_s13, 128  ;;  %p1088_p11 = scmp.lt.s32.totalorder %s1081_s13, %s1875_s1 }
  0x1f   : > { %p1083_p7 = scmp.ne.s32.totalorder %s1081_s13, %s1082_s14  ;;  %p1089_p12 = scmp.lt.s32.totalorder %s1087_s17, %s1082_s14 }
  0x21   : > { %p1085_p9 = pnand %p1084_p8, %p1083_p7  ;;  %p1090_p13 = por %p1089_p12, %p1088_p11 }
  0x23   : > { %p1086_p10 = pneg %p1085_p9 }
  0x25   : > { %p1091_p1 = pnand %p1090_p13, %p1086_p10 }
  0x27   : > { %1094 = shalt.err (!%p1091_p1)
}
  0x28   : > { %s1308_s26 = smov 128   ;;  %s1309_s28 = smov 8  }
  0x29   : > { %1013 = dma.hbm_to_vmem [thread:$0]  (!%p1391_p6), %s223_s8, 2048, %s225_s10, %s1395_s12, %s1308_s26, %s1308_s26, %s1309_s28  }
  0x2a   : > { %s1412_s29 = sadd.s32 4294967295, %s1306_s21   ;;  %s962_s30 = sadd.s32 4294967294, %s1306_s21  }
  0x2b   : > { %p70_p2 = scmp.ne.s32.totalorder %s1298_s19, %s1294_s18  ;;  %p71_p4 = scmp.eq.s32.totalorder %s1412_s29, 0 }
  0x2c   : > { %p146_p5 = scmp.eq.s32.totalorder %s1412_s29, 1  ;;  %p152_p7 = scmp.eq.s32.totalorder %s962_s30, 1 }
  0x2d   : > { %p1421_p9 = por %p71_p4, %p70_p2  ;;  %p963_p10 = scmp.ge.s32.totalorder %s1306_s21, 1 }
  0x2e   : > { %p1429_p11 = por %p146_p5, %p64_p0  ;;  %p1433_p12 = por %p152_p7, %p70_p2 }
  0x2f   : > { %p185_p13 = scmp.lt.s32.totalorder %s1306_s21, 3  ;;  %s1880_s0 = sld [smem:[#allocation21_spill]] }
  0x30   : > { %s1310_s15 = smov [#allocation2]   ;;  %s969_s17 = sshll.u32 %s1382_s27, 2 }
  0x31   : > { %p1441_p1 = pnand %p963_p10, %p185_p13  ;;  %s198_s16 = sshll.u32 %s1310_s15, 4  ;;  %s199_s16 = int_to_ptr.vmem [resolvable:$true] %s198_s16 }
  0x32   : > { %s970_s23 = sshll.u32 %s1306_s21, 2  ;;  %s238_s24 = scalar_lea.vmem [#allocation7], %s969_s17 }
  0x33   : > { %p1006_p0 = pneg %p1441_p1  ;;  %s246_s26 = sshll.u32 %s238_s24, 4  ;;  %s247_s26 = int_to_ptr.vmem [resolvable:$true] %s246_s26 }
  0x34   : > { %s242_s9 = scalar_lea.hbm %s1863_s2, %s970_s23  ;;  %s1311_s10 = smov 64  }
  0x35   : > { %s196_s13 = sshll.u32 %s1880_s0, 4  ;;  %p1007_p2 = pnand %p1006_p0, %p71_p4  ;;  %s197_s13 = int_to_ptr.hbm [resolvable:$true] %s196_s13 }
  0x36   : > { %s1312_s0 = smov 4   ;;  %s244_s1 = sshll.u32 %s242_s9, 4  ;;  %s245_s1 = int_to_ptr.hbm [resolvable:$true] %s244_s1 }
  0x37   : > { %1009 = dma.hbm_to_vmem [thread:$0]  (!%p1007_p2), %s197_s13, 192, %s199_s16, [#allocation3], %s1311_s10, %s1311_s10, %s1312_s0  }
  0x38   : > { %s1140_s15 = sshra.s32 %s245_s1, 4  ;;  %s1147_s22 = scalar_lea.hbm %s1863_s2, 8  ;;  %s1141_s15 = int_to_ptr.hbm [resolvable:$true] %s1140_s15 }
  0x39   : > { %s1142_s25 = scalar_lea.hbm %s1141_s15, 4  ;;  %p1148_p13 = scmp.lt.s32.totalorder %s1141_s15, %s1863_s2 }
  0x3a   : > { %p1143_p5 = scmp.ne.s32.totalorder %s1141_s15, %s1142_s25  ;;  %p1149_p0 = scmp.lt.s32.totalorder %s1147_s22, %s1142_s25 }
  0x3c   : > { %p1145_p7 = pnand %p1143_p5, %p1084_p8  ;;  %p1150_p2 = por %p1149_p0, %p1148_p13 }
  0x3e   : > { %p1146_p10 = pneg %p1145_p7 }
  0x40   : > { %p1151_p3 = pnand %p1150_p2, %p1146_p10 }
  0x42   : > { %1154 = shalt.err (!%p1151_p3)
}
  0x43   : > { %1016 = dma.hbm_to_vmem [thread:$0]  (!%p1391_p6), %s245_s1, 64, %s247_s26, %s1395_s12  }
  0x44   : > { %s261_s16 = scalar_lea.hbm %s1864_s3, %s970_s23  ;;  %s257_s9 = scalar_lea.vmem [#allocation8], %s969_s17 }
  0x45   : > { %s263_s20 = sshll.u32 %s261_s16, 4  ;;  %s265_s10 = sshll.u32 %s257_s9, 4  ;;  %s264_s20 = int_to_ptr.hbm [resolvable:$true] %s263_s20  ;;  %s266_s10 = int_to_ptr.vmem [resolvable:$true] %s265_s10 }
  0x46   : > { %s254_s15 = scalar_lea.sflag [#allocation9], %s1382_s27  ;;  %s1170_s22 = sshra.s32 %s264_s20, 4  ;;  %s1171_s22 = int_to_ptr.hbm [resolvable:$true] %s1170_s22 }
  0x47   : > { %s1172_s25 = scalar_lea.hbm %s1171_s22, 4  ;;  %s1177_s12 = scalar_lea.hbm %s1864_s3, 8 }
  0x48   : > { %p1173_p3 = scmp.ne.s32.totalorder %s1171_s22, %s1172_s25  ;;  %p1178_p10 = scmp.lt.s32.totalorder %s1171_s22, %s1864_s3 }
  0x49   : > { %p1179_p13 = scmp.lt.s32.totalorder %s1177_s12, %s1172_s25 }
  0x4a   : > { %p1175_p5 = pnand %p1173_p3, %p1084_p8 }
  0x4b   : > { %p1180_p0 = por %p1179_p13, %p1178_p10 }
  0x4c   : > { %p1176_p7 = pneg %p1175_p5 }
  0x4e   : > { %p1181_p2 = pnand %p1180_p0, %p1176_p7 }
  0x50   : > { %1184 = shalt.err (!%p1181_p2)
}
  0x51   : > { %1019 = dma.hbm_to_vmem [thread:$0]  (!%p1391_p6), %s264_s20, 64, %s266_s10, %s254_s15  }
  0x52   : > { %274 = sbr.rel (%p1441_p1) target bundleno = 1051 (0x41b), region = 36 }
  0x57   : > { %1273 = dma.done.wait (%p71_p4), [#allocation3], 192  }
  0x58   : > { %1275 = vsyncadd (%p71_p4), [#allocation3], 4294967104  ;;  %s281_s27 = sand.u32 1, %s1412_s29   ;;  %s1489_s17 = sand.u32 1, %s1298_s19  }
  0x59   : > { %s975_s28 = sshll.u32 %s1489_s17, 7  ;;  %s282_s30 = scalar_lea.sflag [#allocation6], %s281_s27 }
  0x5a   : > { %s1492_s11 = scalar_lea.vmem [#allocation5], %s975_s28 }
  0x5b   : > { %1277 = dma.done.wait (%p1421_p9), %s282_s30, 2112  }
  0x5c   : > { %1279 = vsyncadd (%p1421_p9), %s282_s30, 4294965184  ;;  %s1499_s14 = sshll.u32 %s1489_s17, 2  ;;  %s302_s13 = scalar_lea.sflag [#allocation9], %s1489_s17 }
  0x5d   : > { %s295_s0 = scalar_lea.vmem [#allocation7], %s1499_s14  ;;  %s305_s16 = scalar_lea.vmem [#allocation8], %s1499_s14 }
  0x5e   : > { %1281 = dma.done.wait (%p1421_p9), %s302_s13, 64  }
  0x5f   : > { %1283 = vsyncadd (%p1421_p9), %s302_s13, 4294967232  ;;  %v1509_v0 = vld [vmem:[%s1492_s11 + $0x78] sm:$0xff]  ;;  %v1512_v1 = vld [vmem:[%s1492_s11 + $0x70] sm:$0xff]  ;;  %vm393_vm0 = vcmask 1043456   ;;  %v348_v49 = vlaneseq  ;;  %s340_s6 = scalar_lea.vmem [#allocation10], %s1499_s14  ;;  %s987_s20 = sshll.u32 %s1412_s29, 2 }
  0x60   : > { %371 = vmatpush.msra.mxu0 %v1509_v0  ;;  %v1515_v2 = vld [vmem:[%s295_s0] sm:$0xf]  ;;  %440 = vmatpush.xpose.msra.mxu1 %v1509_v0  ;;  %v1519_v3 = vld [vmem:[%s1492_s11 + $0x68] sm:$0xff]  ;;  %v1542_v12 = vld [vmem:[%s1492_s11 + $0x58] sm:$0xff]  ;;  %s785_s15 = scalar_lea.hbm %s1865_s4, %s987_s20  ;;  %s787_s22 = sshll.u32 %s340_s6, 4  ;;  %s788_s22 = int_to_ptr.vmem [resolvable:$true] %s787_s22 }
  0x61   : > { %v391_v4 = vperm.slane %v1515_v2, 0  ;;  %v407_v5 = vperm.slane %v1515_v2, 2  ;;  %507 = vmatpush.msra.mxu2 %v1509_v0  ;;  %571 = vmatpush.xpose.msra.mxu3 %v1509_v0  ;;  %v1530_v7 = vld [vmem:[%s1492_s11 + $0x60] sm:$0xff]  ;;  %v399_v9 = vperm.slane %v1515_v2, 1  ;;  %v415_v10 = vperm.slane %v1515_v2, 3  ;;  %v1549_v14 = vld [vmem:[%s1492_s11 + $0x50] sm:$0xff] }
  0x62   : > { %372 = vmatpush.msra.mxu0 %v1512_v1  ;;  %v1561_v17 = vld [vmem:[%s1492_s11 + $0x48] sm:$0xff]  ;;  %v1568_v19 = vld [vmem:[%s1492_s11 + $0x40] sm:$0xff]  ;;  %v1575_v21 = vld [vmem:[%s1492_s11 + $0x38] sm:$0xff]  ;;  %v1653_v54 = vand.u32 127, %v348_v49  ;;  %s789_s25 = sshll.u32 %s785_s15, 4  ;;  %s770_s24 = scalar_lea.sflag [#allocation4], %s1489_s17  ;;  %s790_s25 = int_to_ptr.hbm [resolvable:$true] %s789_s25 }
  0x63   : > { %v392_v6 = vmul.f32 %v391_v4, %v1515_v2  ;;  %v408_v8 = vmul.f32 %v407_v5, %v1515_v2  ;;  %508 = vmatpush.msra.mxu2 %v1512_v1  ;;  %v400_v15 = vmul.f32 %v399_v9, %v1515_v2  ;;  %v416_v16 = vmul.f32 %v415_v10, %v1515_v2  ;;  %v1581_v22 = vld [vmem:[%s1492_s11 + $0x30] sm:$0xff]  ;;  %v1587_v23 = vld [vmem:[%s1492_s11 + $0x28] sm:$0xff]  ;;  %v1593_v24 = vld [vmem:[%s1492_s11 + $0x20] sm:$0xff]  ;;  %s1214_s1 = sshra.s32 %s790_s25, 4  ;;  %s1220_s27 = scalar_lea.hbm %s1865_s4, 8  ;;  %s1215_s1 = int_to_ptr.hbm [resolvable:$true] %s1214_s1 }
  0x64   : > { %373 = vmatpush.msra.mxu0 %v1519_v3  ;;  %441 = vmatpush.xpose.msra.mxu1 %v1512_v1  ;;  %v1599_v25 = vld [vmem:[%s1492_s11 + $0x18] sm:$0xff]  ;;  %v357_v26 = vld [vmem:[%s1492_s11 + $0x10] sm:$0xff]  ;;  %v356_v27 = vld [vmem:[%s1492_s11 + $0x8] sm:$0xff]  ;;  %vm350_vm5 = vcmp.lt.s32.totalorder %v1653_v54, 32  ;;  %vm351_vm10 = vcmp.lt.s32.totalorder %v1653_v54, 16  ;;  %s1216_s12 = scalar_lea.hbm %s1215_s1, 4  ;;  %p1221_p9 = scmp.lt.s32.totalorder %s1215_s1, %s1865_s4 }
  0x65   : > { %v394_v11 = vsel %vm393_vm0, %v392_v6, 0.0  ;;  %v409_v13 = vsel %vm393_vm0, %v408_v8, 0.0  ;;  %509 = vmatpush.msra.mxu2 %v1519_v3  ;;  %572 = vmatpush.xpose.msra.mxu3 %v1512_v1  ;;  %v401_v18 = vsel %vm393_vm0, %v400_v15, 0.0  ;;  %v417_v20 = vsel %vm393_vm0, %v416_v16, 0.0  ;;  %v355_v28 = vld [vmem:[%s1492_s11] sm:$0xff]  ;;  %p1217_p6 = scmp.ne.s32.totalorder %s1215_s1, %s1216_s12  ;;  %p1222_p1 = scmp.lt.s32.totalorder %s1220_s27, %s1216_s12 }
  0x66   : > { %395 = vadd.xlane.f32.xlu0 %v394_v11  ;;  %374 = vmatpush.msra.mxu0 %v1530_v7  ;;  %v353_v31 = vld [vmem:[%s305_s16] sm:$0xf] }
  0x67   : > { %410 = vadd.xlane.f32.xlu1 %v409_v13  ;;  %510 = vmatpush.msra.mxu2 %v1530_v7  ;;  %v397_v32 = vperm.slane %v353_v31, 0  ;;  %v404_v33 = vperm.slane %v353_v31, 1  ;;  %v412_v34 = vperm.slane %v353_v31, 2  ;;  %v420_v35 = vperm.slane %v353_v31, 3  ;;  %p1218_p8 = pnand %p1217_p6, %p1429_p11  ;;  %p1223_p3 = por %p1222_p1, %p1221_p9 }
  0x68   : > { %375 = vmatpush.msra.mxu0 %v1542_v12  ;;  %442 = vmatpush.xpose.msra.mxu1 %v1519_v3 }
  0x69   : > { %511 = vmatpush.msra.mxu2 %v1542_v12  ;;  %573 = vmatpush.xpose.msra.mxu3 %v1519_v3  ;;  %p1219_p4 = pneg %p1218_p8 }
  0x6a   : > { %376 = vmatpush.msra.mxu0 %v1549_v14 }
  0x6b   : > { %512 = vmatpush.msra.mxu2 %v1549_v14  ;;  %p1224_p5 = pnand %p1223_p3, %p1219_p4 }
  0x6c   : > { %377 = vmatpush.msra.mxu0 %v1561_v17  ;;  %443 = vmatpush.xpose.msra.mxu1 %v1530_v7 }
  0x6d   : > { %513 = vmatpush.msra.mxu2 %v1561_v17  ;;  %574 = vmatpush.xpose.msra.mxu3 %v1530_v7 }
  0x6e   : > { %402 = vadd.xlane.f32.xlu0 %v401_v18  ;;  %378 = vmatpush.msra.mxu0 %v1568_v19 }
  0x6f   : > { %418 = vadd.xlane.f32.xlu1 %v417_v20  ;;  %514 = vmatpush.msra.mxu2 %v1568_v19 }
  0x70   : > { %379 = vmatpush.msra.mxu0 %v1575_v21  ;;  %444 = vmatpush.xpose.msra.mxu1 %v1542_v12 }
  0x71   : > { %515 = vmatpush.msra.mxu2 %v1575_v21  ;;  %575 = vmatpush.xpose.msra.mxu3 %v1542_v12 }
  0x72   : > { %380 = vmatpush.msra.mxu0 %v1581_v22 }
  0x73   : > { %516 = vmatpush.msra.mxu2 %v1581_v22 }
  0x74   : > { %381 = vmatpush.msra.mxu0 %v1587_v23  ;;  %445 = vmatpush.xpose.msra.mxu1 %v1549_v14 }
  0x75   : > { %517 = vmatpush.msra.mxu2 %v1587_v23  ;;  %576 = vmatpush.xpose.msra.mxu3 %v1549_v14 }
  0x76   : > { %382 = vmatpush.msra.mxu0 %v1593_v24 }
  0x77   : > { %518 = vmatpush.msra.mxu2 %v1593_v24 }
  0x78   : > { %383 = vmatpush.msra.mxu0 %v1599_v25  ;;  %446 = vmatpush.xpose.msra.mxu1 %v1561_v17 }
  0x79   : > { %519 = vmatpush.msra.mxu2 %v1599_v25  ;;  %577 = vmatpush.xpose.msra.mxu3 %v1561_v17 }
  0x7a   : > { %384 = vmatpush.msra.mxu0 %v357_v26 }
  0x7b   : > { %520 = vmatpush.msra.mxu2 %v357_v26 }
  0x7c   : > { %385 = vmatpush.msra.mxu0 %v356_v27  ;;  %447 = vmatpush.xpose.msra.mxu1 %v1568_v19 }
  0x7d   : > { %521 = vmatpush.msra.mxu2 %v356_v27  ;;  %578 = vmatpush.xpose.msra.mxu3 %v1568_v19 }
  0x7e   : > { %386 = vmatpush.msra.mxu0 %v355_v28 }
  0x7f   : > { %387 = vmatmul.f32.vlgmr.msra.gmra.mxu0 %v1515_v2  ;;  %522 = vmatpush.msra.mxu2 %v355_v28 }
  0x80   : > { %448 = vmatpush.xpose.msra.mxu1 %v1575_v21  ;;  %638 = vmatpush.msrb.mxu0 %v1509_v0 }
  0x81   : > { %579 = vmatpush.xpose.msra.mxu3 %v1575_v21  ;;  %702 = vmatpush.xpose.msrb.mxu2 %v1509_v0 }
  0x82   : > { %639 = vmatpush.msrb.mxu0 %v1512_v1 }
  0x84   : > { %449 = vmatpush.xpose.msra.mxu1 %v1581_v22  ;;  %640 = vmatpush.msrb.mxu0 %v1519_v3 }
  0x85   : > { %580 = vmatpush.xpose.msra.mxu3 %v1581_v22  ;;  %703 = vmatpush.xpose.msrb.mxu2 %v1512_v1 }
  0x86   : > { %641 = vmatpush.msrb.mxu0 %v1530_v7 }
  0x88   : > { %450 = vmatpush.xpose.msra.mxu1 %v1587_v23  ;;  %642 = vmatpush.msrb.mxu0 %v1542_v12 }
  0x89   : > { %581 = vmatpush.xpose.msra.mxu3 %v1587_v23  ;;  %704 = vmatpush.xpose.msrb.mxu2 %v1519_v3 }
  0x8a   : > { %643 = vmatpush.msrb.mxu0 %v1549_v14 }
  0x8c   : > { %451 = vmatpush.xpose.msra.mxu1 %v1593_v24  ;;  %644 = vmatpush.msrb.mxu0 %v1561_v17 }
  0x8d   : > { %582 = vmatpush.xpose.msra.mxu3 %v1593_v24  ;;  %705 = vmatpush.xpose.msrb.mxu2 %v1530_v7 }
  0x8e   : > { %645 = vmatpush.msrb.mxu0 %v1568_v19 }
  0x90   : > { %452 = vmatpush.xpose.msra.mxu1 %v1599_v25  ;;  %646 = vmatpush.msrb.mxu0 %v1575_v21 }
  0x91   : > { %583 = vmatpush.xpose.msra.mxu3 %v1599_v25  ;;  %706 = vmatpush.xpose.msrb.mxu2 %v1542_v12 }
  0x92   : > { %647 = vmatpush.msrb.mxu0 %v1581_v22 }
  0x94   : > { %453 = vmatpush.xpose.msra.mxu1 %v357_v26  ;;  %648 = vmatpush.msrb.mxu0 %v1587_v23 }
  0x95   : > { %584 = vmatpush.xpose.msra.mxu3 %v357_v26  ;;  %707 = vmatpush.xpose.msrb.mxu2 %v1549_v14 }
  0x96   : > { %649 = vmatpush.msrb.mxu0 %v1593_v24 }
  0x98   : > { %454 = vmatpush.xpose.msra.mxu1 %v356_v27  ;;  %650 = vmatpush.msrb.mxu0 %v1599_v25 }
  0x99   : > { %585 = vmatpush.xpose.msra.mxu3 %v356_v27  ;;  %708 = vmatpush.xpose.msrb.mxu2 %v1561_v17 }
  0x9a   : > { %651 = vmatpush.msrb.mxu0 %v357_v26 }
  0x9c   : > { %455 = vmatpush.xpose.msra.mxu1 %v355_v28  ;;  %652 = vmatpush.msrb.mxu0 %v356_v27 }
  0x9d   : > { %586 = vmatpush.xpose.msra.mxu3 %v355_v28  ;;  %709 = vmatpush.xpose.msrb.mxu2 %v1568_v19 }
  0x9e   : > { %653 = vmatpush.msrb.mxu0 %v355_v28 }
  0xa1   : > { %710 = vmatpush.xpose.msrb.mxu2 %v1575_v21 }
  0xa5   : > { %711 = vmatpush.xpose.msrb.mxu2 %v1581_v22 }
  0xa9   : > { %712 = vmatpush.xpose.msrb.mxu2 %v1587_v23 }
  0xad   : > { %713 = vmatpush.xpose.msrb.mxu2 %v1593_v24 }
  0xb1   : > { %714 = vmatpush.xpose.msrb.mxu2 %v1599_v25 }
  0xb5   : > { %715 = vmatpush.xpose.msrb.mxu2 %v357_v26 }
  0xb9   : > { %716 = vmatpush.xpose.msrb.mxu2 %v356_v27 }
  0xbd   : > { %717 = vmatpush.xpose.msrb.mxu2 %v355_v28 }
  0xd9   : > { %v396_v29 = vpop.xlane.xlu0 %395 }
  0xda   : > { %v411_v30 = vpop.xlane.xlu1 %410  ;;  %v398_v37 = vmul.f32 %v397_v32, %v396_v29  ;;  %v354_v32 = vld [vmem:[#allocation2] sm:$0xf] }
  0xdb   : > { %v413_v40 = vmul.f32 %v412_v34, %v411_v30 }
  0xe1   : > { %v403_v36 = vpop.xlane.xlu0 %402 }
  0xe2   : > { %v405_v38 = vmul.f32 %v404_v33, %v403_v36  ;;  %v419_v39 = vpop.xlane.xlu1 %418 }
  0xe3   : > { %v421_v42 = vmul.f32 %v420_v35, %v419_v39 }
  0xe4   : > { %v406_v41 = vadd.f32 %v405_v38, %v398_v37 }
  0xe6   : > { %v414_v43 = vadd.f32 %v413_v40, %v406_v41 }
  0xe8   : > { %v422_v44 = vadd.f32 %v421_v42, %v414_v43 }
  0xea   : > { %1068 = vrcp.f32 %v422_v44  ;;  %v434_v50 = vand.u32 2147483648, %v422_v44  ;;  %vm428_vm2 = vweird.f32 %v422_v44  ;;  %v432_v52 = vand.u32 2147483647, %v422_v44 }
  0xec   : > { %v435_v55 = vor.u32 1.1754944e-38, %v434_v50  ;;  %vm433_vm4 = vcmp.eq.f32.partialorder %v432_v52, 8.507059e+37 }
  0xf0   : > { %v1069_v45 = vpop.eup %1068 }
  0xf1   : > { %v424_v46 = vmul.f32 %v1069_v45, %v422_v44  ;;  %vm429_vm1 = vweird.f32 %v1069_v45 }
  0xf2   : > { %vm430_vm3 = vmor %vm428_vm2, %vm429_vm1 }
  0xf3   : > { %v425_v47 = vsub.f32 1.0, %v424_v46 }
  0xf5   : > { %v426_v48 = vmul.f32 %v1069_v45, %v425_v47 }
  0xf7   : > { %v427_v51 = vadd.f32 %v1069_v45, %v426_v48 }
  0xf9   : > { %v431_v53 = vsel %vm430_vm3, %v1069_v45, %v427_v51 }
  0xfa   : > { %v436_v57 = vsel %vm433_vm4, %v435_v55, %v431_v53 }
  0xfc   : > { %v388_v56 = vpop.f32.mrf.mxu0 }
  0xfd   : > { %v437_v58 = vmul.f32 %v436_v57, %v388_v56 }
  0xff   : > { %v438_v59 = vmul.f32 %v437_v58, %v353_v31 }
 0x101   : > { %v1658_v60 = vsel %vm350_vm5, %v438_v59, 0.0  ;;  %980 = vmatmul.msk.f32.vlgmr.msra.gmra.mxu1 %vm350_vm5, %v438_v59 }
 0x102   : > { %v480_v61 = vperm.slane %v1658_v60, 3  ;;  %v473_v62 = vperm.slane %v1658_v60, 2  ;;  %v460_v63 = vperm.slane %v1658_v60, 0  ;;  %v466_v11 = vperm.slane %v1658_v60, 1 }
 0x104   : > { %v481_v0 = vmul.f32 %v480_v61, %v1658_v60  ;;  %v474_v1 = vmul.f32 %v473_v62, %v1658_v60  ;;  %v461_v3 = vmul.f32 %v460_v63, %v1658_v60  ;;  %v467_v12 = vmul.f32 %v466_v11, %v1658_v60 }
 0x106   : > { %v482_v6 = vsel %vm393_vm0, %v481_v0, 0.0  ;;  %v475_v7 = vsel %vm393_vm0, %v474_v1, 0.0  ;;  %v462_v8 = vsel %vm393_vm0, %v461_v3, 0.0  ;;  %v468_v13 = vsel %vm393_vm0, %v467_v12, 0.0 }
 0x107   : > { %483 = vadd.xlane.f32.xlu1 %v482_v6  ;;  %476 = vadd.xlane.f32.xlu0 %v475_v7 }
 0x108   : > { %463 = vadd.xlane.f32.xlu2 %v462_v8 }
 0x110   : > { %469 = vadd.xlane.f32.xlu2 %v468_v13 }
 0x17a   : > { %v477_v15 = vpop.xlane.xlu0 %476  ;;  %v484_v19 = vpop.xlane.xlu1 %483 }
 0x17b   : > { %v464_v14 = vpop.xlane.xlu2 %463  ;;  %v478_v20 = vmul.f32 %v477_v15, %v407_v5  ;;  %v485_v22 = vmul.f32 %v484_v19, %v415_v10 }
 0x17c   : > { %v465_v17 = vmul.f32 %v464_v14, %v391_v4 }
 0x17e   : > { %v457_v5 = vpop.f32.mrf.mxu1 }
 0x183   : > { %v470_v16 = vpop.xlane.xlu2 %469 }
 0x184   : > { %v471_v18 = vmul.f32 %v470_v16, %v399_v9 }
 0x186   : > { %v472_v21 = vadd.f32 %v471_v18, %v465_v17 }
 0x188   : > { %v479_v23 = vadd.f32 %v478_v20, %v472_v21 }
 0x18a   : > { %v486_v24 = vadd.f32 %v485_v22, %v479_v23 }
 0x18c   : > { %1070 = vrcp.f32 %v486_v24  ;;  %v498_v28 = vand.u32 2147483648, %v486_v24  ;;  %v496_v4 = vand.u32 2147483647, %v486_v24  ;;  %vm492_vm7 = vweird.f32 %v486_v24 }
 0x18e   : > { %v499_v9 = vor.u32 1.1754944e-38, %v498_v28  ;;  %vm497_vm9 = vcmp.eq.f32.partialorder %v496_v4, 8.507059e+37 }
 0x192   : > { %v1071_v25 = vpop.eup %1070 }
 0x193   : > { %v488_v26 = vmul.f32 %v1071_v25, %v486_v24  ;;  %vm493_vm6 = vweird.f32 %v1071_v25 }
 0x194   : > { %vm494_vm8 = vmor %vm492_vm7, %vm493_vm6 }
 0x195   : > { %v489_v27 = vsub.f32 1.0, %v488_v26 }
 0x197   : > { %v490_v29 = vmul.f32 %v1071_v25, %v489_v27 }
 0x199   : > { %v491_v30 = vadd.f32 %v1071_v25, %v490_v29 }
 0x19b   : > { %v495_v31 = vsel %vm494_vm8, %v1071_v25, %v491_v30 }
 0x19c   : > { %v500_v33 = vsel %vm497_vm9, %v499_v9, %v495_v31 }
 0x19d   : > { %v501_v10 = vmul.f32 %v500_v33, %v457_v5 }
 0x19f   : > { %v502_v34 = vmul.f32 %v501_v10, %v354_v32 }
 0x1a1   : > { %v503_v35 = vmul.f32 %v502_v34, %v1515_v2 }
 0x1a3   : > { %v1692_v36 = vsel %vm351_vm10, %v503_v35, 0.0  ;;  %981 = vmatmul.msk.f32.vlgmr.msra.gmra.mxu2 %vm351_vm10, %v503_v35 }
 0x1a4   : > { %v540_v37 = vperm.slane %v1692_v36, 2  ;;  %v533_v38 = vperm.slane %v1692_v36, 1  ;;  %v527_v39 = vperm.slane %v1692_v36, 0  ;;  %v547_v45 = vperm.slane %v1692_v36, 3 }
 0x1a6   : > { %v541_v40 = vmul.f32 %v540_v37, %v1692_v36  ;;  %v534_v2 = vmul.f32 %v533_v38, %v1692_v36  ;;  %v528_v41 = vmul.f32 %v527_v39, %v1692_v36  ;;  %v548_v46 = vmul.f32 %v547_v45, %v1692_v36 }
 0x1a8   : > { %v542_v42 = vsel %vm393_vm0, %v541_v40, 0.0  ;;  %v535_v43 = vsel %vm393_vm0, %v534_v2, 0.0  ;;  %v529_v44 = vsel %vm393_vm0, %v528_v41, 0.0  ;;  %v549_v47 = vsel %vm393_vm0, %v548_v46, 0.0 }
 0x1a9   : > { %543 = vadd.xlane.f32.xlu1 %v542_v42  ;;  %536 = vadd.xlane.f32.xlu0 %v535_v43 }
 0x1aa   : > { %530 = vadd.xlane.f32.xlu2 %v529_v44  ;;  %v506_v44 = vld [vmem:[#allocation2 + $0x4] sm:$0xf] }
 0x1b2   : > { %550 = vadd.xlane.f32.xlu2 %v549_v47 }
 0x21c   : > { %v537_v48 = vpop.xlane.xlu0 %536  ;;  %v544_v52 = vpop.xlane.xlu1 %543 }
 0x21d   : > { %v531_v49 = vpop.xlane.xlu2 %530  ;;  %v538_v50 = vmul.f32 %v537_v48, %v466_v11  ;;  %v545_v55 = vmul.f32 %v544_v52, %v473_v62 }
 0x21e   : > { %v532_v51 = vmul.f32 %v531_v49, %v460_v63 }
 0x220   : > { %v539_v53 = vadd.f32 %v538_v50, %v532_v51 }
 0x222   : > { %v546_v57 = vadd.f32 %v545_v55, %v539_v53 }
 0x225   : > { %v551_v56 = vpop.xlane.xlu2 %550 }
 0x226   : > { %v552_v58 = vmul.f32 %v551_v56, %v480_v61  ;;  %v524_v62 = vpop.f32.mrf.mxu2 }
 0x228   : > { %v553_v59 = vadd.f32 %v552_v58, %v546_v57 }
 0x22a   : > { %1072 = vrcp.f32 %v553_v59  ;;  %v565_v6 = vand.u32 2147483648, %v553_v59  ;;  %v563_v8 = vand.u32 2147483647, %v553_v59  ;;  %vm559_vm12 = vweird.f32 %v553_v59 }
 0x22c   : > { %v566_v11 = vor.u32 1.1754944e-38, %v565_v6  ;;  %vm564_vm14 = vcmp.eq.f32.partialorder %v563_v8, 8.507059e+37 }
 0x230   : > { %v1073_v0 = vpop.eup %1072 }
 0x231   : > { %v555_v1 = vmul.f32 %v1073_v0, %v553_v59  ;;  %vm560_vm11 = vweird.f32 %v1073_v0 }
 0x232   : > { %vm561_vm13 = vmor %vm559_vm12, %vm560_vm11 }
 0x233   : > { %v556_v3 = vsub.f32 1.0, %v555_v1 }
 0x235   : > { %v557_v7 = vmul.f32 %v1073_v0, %v556_v3 }
 0x237   : > { %v558_v63 = vadd.f32 %v1073_v0, %v557_v7 }
 0x239   : > { %v562_v12 = vsel %vm561_vm13, %v1073_v0, %v558_v63 }
 0x23a   : > { %v567_v13 = vsel %vm564_vm14, %v566_v11, %v562_v12 }
 0x23b   : > { %v568_v14 = vmul.f32 %v567_v13, %v524_v62 }
 0x23d   : > { %v569_v61 = vmul.f32 %v568_v14, %v1658_v60 }
 0x23f   : > { %v1723_v15 = vsel %vm350_vm5, %v569_v61, 0.0  ;;  %982 = vmatmul.msk.f32.vlgmr.msra.gmra.mxu3 %vm350_vm5, %v569_v61 }
 0x240   : > { %v604_v16 = vperm.slane %v1723_v15, 2  ;;  %v597_v17 = vperm.slane %v1723_v15, 1  ;;  %v591_v18 = vperm.slane %v1723_v15, 0  ;;  %v611_v24 = vperm.slane %v1723_v15, 3 }
 0x242   : > { %v605_v19 = vmul.f32 %v604_v16, %v1723_v15  ;;  %v598_v60 = vmul.f32 %v597_v17, %v1723_v15  ;;  %v592_v20 = vmul.f32 %v591_v18, %v1723_v15  ;;  %v612_v25 = vmul.f32 %v611_v24, %v1723_v15 }
 0x244   : > { %v606_v21 = vsel %vm393_vm0, %v605_v19, 0.0  ;;  %v599_v22 = vsel %vm393_vm0, %v598_v60, 0.0  ;;  %v593_v23 = vsel %vm393_vm0, %v592_v20, 0.0  ;;  %v613_v26 = vsel %vm393_vm0, %v612_v25, 0.0 }
 0x245   : > { %607 = vadd.xlane.f32.xlu2 %v606_v21  ;;  %600 = vadd.xlane.f32.xlu1 %v599_v22 }
 0x246   : > { %594 = vadd.xlane.f32.xlu0 %v593_v23 }
 0x24e   : > { %614 = vadd.xlane.f32.xlu0 %v613_v26 }
 0x2b8   : > { %v601_v27 = vpop.xlane.xlu1 %600  ;;  %v608_v30 = vpop.xlane.xlu2 %607 }
 0x2b9   : > { %v595_v28 = vpop.xlane.xlu0 %594  ;;  %v602_v29 = vmul.f32 %v601_v27, %v533_v38  ;;  %v609_v31 = vmul.f32 %v608_v30, %v540_v37 }
 0x2ba   : > { %v596_v4 = vmul.f32 %v595_v28, %v527_v39 }
 0x2bc   : > { %v603_v9 = vadd.f32 %v602_v29, %v596_v4 }
 0x2be   : > { %v610_v32 = vadd.f32 %v609_v31, %v603_v9 }
 0x2c1   : > { %v615_v5 = vpop.xlane.xlu0 %614 }
 0x2c2   : > { %v616_v33 = vmul.f32 %v615_v5, %v547_v45  ;;  %v588_v37 = vpop.f32.mrf.mxu3 }
 0x2c4   : > { %v617_v10 = vadd.f32 %v616_v33, %v610_v32 }
 0x2c6   : > { %1074 = vrcp.f32 %v617_v10  ;;  %v629_v2 = vand.u32 2147483648, %v617_v10  ;;  %v627_v38 = vand.u32 2147483647, %v617_v10  ;;  %vm623_vm1 = vweird.f32 %v617_v10 }
 0x2c8   : > { %v630_v39 = vor.u32 1.1754944e-38, %v629_v2  ;;  %vm628_vm3 = vcmp.eq.f32.partialorder %v627_v38, 8.507059e+37 }
 0x2cc   : > { %v1075_v34 = vpop.eup %1074 }
 0x2cd   : > { %v619_v35 = vmul.f32 %v1075_v34, %v617_v10  ;;  %vm624_vm15 = vweird.f32 %v1075_v34 }
 0x2ce   : > { %vm625_vm2 = vmor %vm623_vm1, %vm624_vm15 }
 0x2cf   : > { %v620_v40 = vsub.f32 1.0, %v619_v35 }
 0x2d1   : > { %v621_v41 = vmul.f32 %v1075_v34, %v620_v40 }
 0x2d3   : > { %v622_v42 = vadd.f32 %v1075_v34, %v621_v41 }
 0x2d5   : > { %v626_v43 = vsel %vm625_vm2, %v1075_v34, %v622_v42 }
 0x2d6   : > { %v631_v46 = vsel %vm628_vm3, %v630_v39, %v626_v43 }
 0x2d7   : > { %v632_v47 = vmul.f32 %v631_v46, %v588_v37 }
 0x2d9   : > { %v633_v45 = vmul.f32 %v632_v47, %v506_v44 }
 0x2db   : > { %v634_v48 = vmul.f32 %v633_v45, %v1692_v36 }
 0x2dd   : > { %v1756_v49 = vsel %vm351_vm10, %v634_v48, 0.0  ;;  %983 = vmatmul.msk.f32.vlgmr.msrb.gmra.mxu0 %vm351_vm10, %v634_v48 }
 0x2de   : > { %v671_v50 = vperm.slane %v1756_v49, 2  ;;  %v664_v51 = vperm.slane %v1756_v49, 1  ;;  %v658_v52 = vperm.slane %v1756_v49, 0  ;;  %v678_v59 = vperm.slane %v1756_v49, 3 }
 0x2e0   : > { %v672_v53 = vmul.f32 %v671_v50, %v1756_v49  ;;  %v665_v36 = vmul.f32 %v664_v51, %v1756_v49  ;;  %v659_v55 = vmul.f32 %v658_v52, %v1756_v49  ;;  %v679_v0 = vmul.f32 %v678_v59, %v1756_v49 }
 0x2e2   : > { %v673_v56 = vsel %vm393_vm0, %v672_v53, 0.0  ;;  %v666_v57 = vsel %vm393_vm0, %v665_v36, 0.0  ;;  %v660_v58 = vsel %vm393_vm0, %v659_v55, 0.0  ;;  %v680_v1 = vsel %vm393_vm0, %v679_v0, 0.0 }
 0x2e3   : > { %674 = vadd.xlane.f32.xlu0 %v673_v56  ;;  %667 = vadd.xlane.f32.xlu2 %v666_v57 }
 0x2e4   : > { %661 = vadd.xlane.f32.xlu1 %v660_v58 }
 0x2ec   : > { %681 = vadd.xlane.f32.xlu1 %v680_v1 }
 0x356   : > { %v668_v3 = vpop.xlane.xlu2 %667  ;;  %v675_v63 = vpop.xlane.xlu0 %674 }
 0x357   : > { %v662_v6 = vpop.xlane.xlu1 %661  ;;  %v669_v7 = vmul.f32 %v668_v3, %v597_v17  ;;  %v676_v12 = vmul.f32 %v675_v63, %v604_v16 }
 0x358   : > { %v663_v8 = vmul.f32 %v662_v6, %v591_v18 }
 0x35a   : > { %v670_v11 = vadd.f32 %v669_v7, %v663_v8  ;;  %v655_v25 = vpop.f32.mrf.mxu0 }
 0x35c   : > { %v677_v13 = vadd.f32 %v676_v12, %v670_v11 }
 0x35f   : > { %v682_v62 = vpop.xlane.xlu1 %681 }
 0x360   : > { %v683_v14 = vmul.f32 %v682_v62, %v611_v24 }
 0x362   : > { %v684_v61 = vadd.f32 %v683_v14, %v677_v13 }
 0x364   : > { %1076 = vrcp.f32 %v684_v61  ;;  %v696_v21 = vand.u32 2147483648, %v684_v61  ;;  %v694_v22 = vand.u32 2147483647, %v684_v61  ;;  %vm690_vm6 = vweird.f32 %v684_v61 }
 0x366   : > { %v697_v23 = vor.u32 1.1754944e-38, %v696_v21  ;;  %vm695_vm8 = vcmp.eq.f32.partialorder %v694_v22, 8.507059e+37 }
 0x36a   : > { %v1077_v19 = vpop.eup %1076 }
 0x36b   : > { %v686_v60 = vmul.f32 %v1077_v19, %v684_v61  ;;  %vm691_vm4 = vweird.f32 %v1077_v19 }
 0x36c   : > { %vm692_vm7 = vmor %vm690_vm6, %vm691_vm4 }
 0x36d   : > { %v687_v20 = vsub.f32 1.0, %v686_v60 }
 0x36f   : > { %v688_v17 = vmul.f32 %v1077_v19, %v687_v20 }
 0x371   : > { %v689_v18 = vadd.f32 %v1077_v19, %v688_v17 }
 0x373   : > { %v693_v16 = vsel %vm692_vm7, %v1077_v19, %v689_v18 }
 0x374   : > { %v698_v26 = vsel %vm695_vm8, %v697_v23, %v693_v16 }
 0x375   : > { %v699_v27 = vmul.f32 %v698_v26, %v655_v25 }
 0x377   : > { %v700_v24 = vmul.f32 %v699_v27, %v1723_v15 }
 0x379   : > { %v701_v28 = vsel %vm350_vm5, %v700_v24, 0.0  ;;  %984 = vmatmul.msk.f32.vlgmr.msrb.gmra.mxu2 %vm350_vm5, %v700_v24 }
 0x37a   : > { %v735_v29 = vperm.slane %v701_v28, 2  ;;  %v728_v4 = vperm.slane %v701_v28, 1  ;;  %v722_v30 = vperm.slane %v701_v28, 0  ;;  %767 = vst [vmem:[%s340_s6] sm:$0xf] %v701_v28  ;;  %v742_v10 = vperm.slane %v701_v28, 3 }
 0x37c   : > { %v736_v9 = vmul.f32 %v735_v29, %v701_v28  ;;  %v729_v31 = vmul.f32 %v728_v4, %v701_v28  ;;  %v723_v5 = vmul.f32 %v722_v30, %v701_v28  ;;  %v743_v34 = vmul.f32 %v742_v10, %v701_v28 }
 0x37e   : > { %v737_v32 = vsel %vm393_vm0, %v736_v9, 0.0  ;;  %v730_v15 = vsel %vm393_vm0, %v729_v31, 0.0  ;;  %v724_v33 = vsel %vm393_vm0, %v723_v5, 0.0  ;;  %v744_v35 = vsel %vm393_vm0, %v743_v34, 0.0 }
 0x37f   : > { %738 = vadd.xlane.f32.xlu1 %v737_v32  ;;  %731 = vadd.xlane.f32.xlu0 %v730_v15 }
 0x380   : > { %725 = vadd.xlane.f32.xlu2 %v724_v33 }
 0x388   : > { %745 = vadd.xlane.f32.xlu2 %v744_v35 }
 0x389   : > { %1227 = shalt.err (!%p1224_p5)
}
 0x38a   : > { %1002 = dma.vmem_to_hbm [thread:$0]  (%p1429_p11), %s788_s22, 64, %s790_s25, %s770_s24   ;;  %v637_v57 = vld [vmem:[#allocation2 + $0x8] sm:$0xf] }
 0x38b   : > { %s799_s13 = scalar_lea.hbm %s1866_s5, %s987_s20  ;;  %s347_s16 = scalar_lea.vmem [#allocation11], %s1499_s14 }
 0x38c   : > { %s801_s6 = sshll.u32 %s347_s16, 4  ;;  %s803_s9 = sshll.u32 %s799_s13, 4  ;;  %s802_s6 = int_to_ptr.vmem [resolvable:$true] %s801_s6  ;;  %s804_s9 = int_to_ptr.hbm [resolvable:$true] %s803_s9 }
 0x38d   : > { %s775_s10 = scalar_lea.sflag [#allocation12], %s1489_s17  ;;  %s1242_s29 = sshra.s32 %s804_s9, 4  ;;  %s1243_s29 = int_to_ptr.hbm [resolvable:$true] %s1242_s29 }
 0x38e   : > { %s1244_s15 = scalar_lea.hbm %s1243_s29, 4  ;;  %s1248_s22 = scalar_lea.hbm %s1866_s5, 8 }
 0x38f   : > { %p1245_p7 = scmp.ne.s32.totalorder %s1243_s29, %s1244_s15  ;;  %p1249_p0 = scmp.lt.s32.totalorder %s1243_s29, %s1866_s5 }
 0x390   : > { %p1250_p2 = scmp.lt.s32.totalorder %s1248_s22, %s1244_s15 }
 0x391   : > { %p1246_p10 = pnand %p1245_p7, %p1429_p11 }
 0x392   : > { %p1251_p6 = por %p1250_p2, %p1249_p0 }
 0x393   : > { %p1247_p13 = pneg %p1246_p10 }
 0x395   : > { %p1252_p8 = pnand %p1251_p6, %p1247_p13 }
 0x3f2   : > { %v732_v40 = vpop.xlane.xlu0 %731  ;;  %v739_v42 = vpop.xlane.xlu1 %738 }
 0x3f3   : > { %v726_v2 = vpop.xlane.xlu2 %725  ;;  %v733_v41 = vmul.f32 %v732_v40, %v664_v51  ;;  %v740_v43 = vmul.f32 %v739_v42, %v671_v50 }
 0x3f4   : > { %v727_v38 = vmul.f32 %v726_v2, %v658_v52 }
 0x3f6   : > { %v734_v39 = vadd.f32 %v733_v41, %v727_v38 }
 0x3f8   : > { %v741_v37 = vadd.f32 %v740_v43, %v734_v39 }
 0x3fb   : > { %v746_v44 = vpop.xlane.xlu2 %745 }
 0x3fc   : > { %v747_v46 = vmul.f32 %v746_v44, %v678_v59  ;;  %v719_v58 = vpop.f32.mrf.mxu2 }
 0x3fe   : > { %v748_v47 = vadd.f32 %v747_v46, %v741_v37 }
 0x400   : > { %1078 = vrcp.f32 %v748_v47  ;;  %v760_v51 = vand.u32 2147483648, %v748_v47  ;;  %v758_v52 = vand.u32 2147483647, %v748_v47  ;;  %vm754_vm5 = vweird.f32 %v748_v47 }
 0x402   : > { %v761_v50 = vor.u32 1.1754944e-38, %v760_v51  ;;  %vm759_vm11 = vcmp.eq.f32.partialorder %v758_v52, 8.507059e+37 }
 0x406   : > { %v1079_v45 = vpop.eup %1078 }
 0x407   : > { %v750_v48 = vmul.f32 %v1079_v45, %v748_v47  ;;  %vm755_vm0 = vweird.f32 %v1079_v45 }
 0x408   : > { %vm756_vm9 = vmor %vm754_vm5, %vm755_vm0 }
 0x409   : > { %v751_v53 = vsub.f32 1.0, %v750_v48 }
 0x40b   : > { %v752_v36 = vmul.f32 %v1079_v45, %v751_v53 }
 0x40d   : > { %v753_v55 = vadd.f32 %v1079_v45, %v752_v36 }
 0x40f   : > { %v757_v56 = vsel %vm756_vm9, %v1079_v45, %v753_v55 }
 0x410   : > { %v762_v59 = vsel %vm759_vm11, %v761_v50, %v757_v56 }
 0x411   : > { %v763_v0 = vmul.f32 %v762_v59, %v719_v58 }
 0x413   : > { %v764_v1 = vmul.f32 %v763_v0, %v637_v57 }
 0x415   : > { %v765_v3 = vmul.f32 %v764_v1, %v1756_v49 }
 0x417   : > { %v766_v6 = vsel %vm351_vm10, %v765_v3, 0.0 }
 0x418   : > { %768 = vst [vmem:[%s347_s16] sm:$0xf] %v766_v6 }
 0x419   : > { %1255 = shalt.err (!%p1252_p8)
}
 0x41a   : > { %1003 = dma.vmem_to_hbm [thread:$0]  (%p1429_p11), %s802_s6, 64, %s804_s9, %s775_s10  }
 0x41b PF: > { %s815_s17 = sand.u32 1, %s1294_s18   ;;  %p1882_p4 = scmp.ge.s32.totalorder %s1306_s21, 2 }
 0x41c   : > { %s816_s1 = scalar_lea.sflag [#allocation4], %s815_s17 }
 0x41d   : > { %p1021_p9 = pnand %p1882_p4, %p1433_p12 }
 0x41f   : > { %p1022_p1 = pneg %p1021_p9 }
 0x421   : > { %1285 = dma.done.wait (%p1022_p1), %s816_s1, 64  }
 0x422   : > { %1287 = vsyncadd (%p1022_p1), %s816_s1, 4294967232  ;;  %s826_s12 = scalar_lea.sflag [#allocation12], %s815_s17 }
 0x423   : > { %1289 = dma.done.wait (%p1022_p1), %s826_s12, 64  }
 0x424   : > { %1291 = vsyncadd (%p1022_p1), %s826_s12, 4294967232  ;;  %s1883_s21 = sld [smem:[#allocation19_spill]]  ;;  %s1886_s18 = smov %s1298_s19 }
 0x425   : > { %s1884_s26 = sld [smem:[#allocation18_spill]] }
 0x426   : > { %s1885_s20 = sld [smem:[#allocation20_spill]] }
 0x42a   : > { %p26_p11 = scmp.ge.s32.totalorder %s1883_s21, 4  }
 0x42b   : > { %s1887_s19 = smov %s1884_s26 }
 0x42c   :  { %28 = sbr.rel (!%p26_p11) target bundleno = 13 (0xd), region = 129 }
 0x431   :  { %832 = vsyncpa [#allocation3], 1 }
 0x432   :  { %834 = vsyncpa [#allocation3 + $0x1], 1 }
 0x433   :  { %835 = vsyncpa [#allocation6], 1 }
 0x434   :  { %837 = vsyncpa [#allocation6 + $0x1], 1 }
 0x435   :  { %838 = vsyncpa [#allocation9], 1 }
 0x436   :  { %840 = vsyncpa [#allocation9 + $0x1], 1 }
 0x437   :  { %841 = vsyncpa [#allocation4], 1 }
 0x438   :  { %843 = vsyncpa [#allocation4 + $0x1], 1 }
 0x439   :  { %844 = vsyncpa [#allocation12], 1 }
 0x43a   :  { %846 = vsyncpa [#allocation12 + $0x1], 1 }

</bundles_post_ra>
